<compile_context>
chip_gen: v5e
topology: v5e:2x2
jax: 0.10.0
libtpu: 0.0.40
codegen_flags: <defaults>
</compile_context>

<pallas_src>
import jax
import jax.numpy as jnp
from jax.experimental import pallas as pl
from jax.experimental.pallas import tpu as pltpu


_MIN_KERNEL_BYTES = 256 * 1024          # below this, fused XLA wins
_TARGET_BLOCK_BYTES = 4 * 1024 * 1024   # per-array per-block VMEM budget


def _weighted_sum_kernel(w_ref, x1_ref, x2_ref, o_ref):
    # w_ref: SMEM (2,) float32 -> [w1, w2]  (scalar-prefetch arg)
    w1 = w_ref[0]
    w2 = w_ref[1]
    x1 = x1_ref[...].astype(jnp.float32)
    x2 = x2_ref[...].astype(jnp.float32)
    o_ref[...] = (x1 * w1 + x2 * w2).astype(o_ref.dtype)


def _plain_weighted_sum(input1, input2, w1f, w2f, out_dtype):
    return (input1 * w1f + input2 * w2f).astype(out_dtype)


def weighted_sum(input1, input2, w1, w2):
    """input1, input2: same-shape arrays (e.g. NCHW). w1, w2: scalar params shape (1,)."""
    assert input1.shape == input2.shape, "WeightedSum expects equal shapes"
    orig_shape = input1.shape
    dtype = input1.dtype

    # Keep weights in f32 regardless of input dtype (matches PyTorch promotion
    # of inputs by float32 Parameters).
    w1f = jnp.asarray(w1, jnp.float32).reshape(())
    w2f = jnp.asarray(w2, jnp.float32).reshape(())
    out_dtype = jnp.result_type(dtype, jnp.float32)

    total = 1
    for d in orig_shape:
        total *= d
    itemsize = jnp.dtype(dtype).itemsize
    total_bytes = total * itemsize

    # Fast path: tiny or lane-unaligned inputs, or mixed dtypes -> fused XLA.
    # Avoids any pad/slice copies (this op is purely HBM-bandwidth-bound).
    if (total_bytes < _MIN_KERNEL_BYTES
            or total % 128 != 0
            or input1.dtype != input2.dtype):
        return _plain_weighted_sum(input1, input2, w1f, w2f, out_dtype)

    # Largest lane width (multiple of 128) that divides total -> free reshape.
    lane = 128
    for cand in (1024, 512, 256):
        if total % cand == 0:
            lane = cand
            break
    rows = total // lane

    # Byte-based tile sizing (~4 MiB per block), multiple of 8 sublanes.
    tile_m = max(8, (_TARGET_BLOCK_BYTES // (lane * itemsize)) // 8 * 8)
    # Keep at least 2 grid steps so v7x's two TensorCores both get work.
    half8 = ((-(-rows // 2) + 7) // 8) * 8
    tile_m = min(tile_m, half8)
    grid_m = pl.cdiv(rows, tile_m)   # partial edge block is masked by Pallas

    x1 = input1.reshape(rows, lane)  # no-copy views (contiguous)
    x2 = input2.reshape(rows, lane)
    w = jnp.stack([w1f, w2f]).astype(jnp.float32)

    out2d = pl.pallas_call(
        _weighted_sum_kernel,
        out_shape=jax.ShapeDtypeStruct((rows, lane), out_dtype),
        grid_spec=pltpu.PrefetchScalarGridSpec(
            num_scalar_prefetch=1,
            grid=(grid_m,),
            in_specs=[
                pl.BlockSpec((tile_m, lane), lambda i, w: (i, 0)),
                pl.BlockSpec((tile_m, lane), lambda i, w: (i, 0)),
            ],
            out_specs=pl.BlockSpec((tile_m, lane), lambda i, w: (i, 0)),
        ),
        compiler_params=pltpu.CompilerParams(
            dimension_semantics=("parallel",),
            vmem_limit_bytes=32 * 1024 * 1024,
        ),
    )(w, x1, x2)

    return out2d.reshape(orig_shape)


if __name__ == "__main__":
    key = jax.random.PRNGKey(0)
    k1, k2, k3, k4, k5, k6, k7, k8 = jax.random.split(key, 8)

    # Deterministic "parameters" (torch.FloatTensor(1) is uninitialized memory;
    # we just pick deterministic scalar values here).
    w1 = jax.random.normal(k3, (1,), dtype=jnp.float32)
    w2 = jax.random.normal(k4, (1,), dtype=jnp.float32)

    ok = True

    # 1) Small NCHW input consistent with the module (wrapper fast path).
    a1 = jax.random.normal(k1, (2, 4, 16, 16), dtype=jnp.float32)
    a2 = jax.random.normal(k2, (2, 4, 16, 16), dtype=jnp.float32)
    out_a = jax.block_until_ready(weighted_sum(a1, a2, w1, w2))
    ref_a = a1 * w1 + a2 * w2
    ok &= bool(jnp.allclose(out_a, ref_a, atol=1e-5, rtol=1e-5))

    # 2) Larger lane-aligned input -> Pallas kernel path, grid >= 2 steps.
    b1 = jax.random.normal(k5, (8, 16, 64, 64), dtype=jnp.float32)
    b2 = jax.random.normal(k6, (8, 16, 64, 64), dtype=jnp.float32)
    out_b = jax.block_until_ready(weighted_sum(b1, b2, w1, w2))
    ref_b = b1 * w1 + b2 * w2
    ok &= bool(jnp.allclose(out_b, ref_b, atol=1e-5, rtol=1e-5))

    # 3) 128-aligned but not 1024-aligned row count -> partial edge block.
    c1 = jax.random.normal(k7, (2053, 128), dtype=jnp.float32)
    c2 = jax.random.normal(k8, (2053, 128), dtype=jnp.float32)
    out_c = jax.block_until_ready(weighted_sum(c1, c2, w1, w2))
    ref_c = c1 * w1 + c2 * w2
    ok &= bool(jnp.allclose(out_c, ref_c, atol=1e-5, rtol=1e-5))

    assert ok, "mismatch vs reference"
    print("KERNEL_OK")
</pallas_src>

<mosaic_0001>
module attributes {stable_mosaic.version = 11 : i64} {
  func.func @_weighted_sum_kernel(%arg0: i32, %arg1: memref<2xf32, #tpu.memory_space<smem>>, %arg2: memref<256x1024xf32, #tpu.memory_space<vmem>>, %arg3: memref<256x1024xf32, #tpu.memory_space<vmem>>, %arg4: memref<256x1024xf32, #tpu.memory_space<vmem>>) attributes {dimension_semantics = [#tpu.dimension_semantics<parallel>], iteration_bounds = array<i64: 2>, scalar_prefetch = 1 : i64, scratch_operands = 0 : i64, tpu.core_type = #tpu.core_type<tc>, window_params = [{transform_indices = @transform_0, window_bounds = array<i64: 256, 1024>}, {transform_indices = @transform_1, window_bounds = array<i64: 256, 1024>}, {transform_indices = @transform_2, window_bounds = array<i64: 256, 1024>}]} {
    %c0 = arith.constant 0 : index
    %0 = memref.load %arg1[%c0] : memref<2xf32, #tpu.memory_space<smem>>
    %c1 = arith.constant 1 : index
    %1 = memref.load %arg1[%c1] : memref<2xf32, #tpu.memory_space<smem>>
    %c0_0 = arith.constant 0 : index
    %c0_1 = arith.constant 0 : index
    %2 = vector.load %arg2[%c0_0, %c0_1] : memref<256x1024xf32, #tpu.memory_space<vmem>>, vector<256x1024xf32>
    %c0_2 = arith.constant 0 : index
    %c0_3 = arith.constant 0 : index
    %3 = vector.load %arg3[%c0_2, %c0_3] : memref<256x1024xf32, #tpu.memory_space<vmem>>, vector<256x1024xf32>
    %4 = vector.broadcast %0 : f32 to vector<256x1024xf32>
    %5 = arith.mulf %2, %4 : vector<256x1024xf32>
    %6 = vector.broadcast %1 : f32 to vector<256x1024xf32>
    %7 = arith.mulf %3, %6 : vector<256x1024xf32>
    %8 = arith.addf %5, %7 : vector<256x1024xf32>
    %c0_4 = arith.constant 0 : index
    %c0_5 = arith.constant 0 : index
    %9 = vector.load %arg4[%c0_4, %c0_5] : memref<256x1024xf32, #tpu.memory_space<vmem>>, vector<256x1024xf32>
    tpu.vector_store %arg4[%c0_4, %c0_5], %8 {strides = array<i32>} : memref<256x1024xf32, #tpu.memory_space<vmem>>, vector<256x1024xf32>,
    return
  }
  func.func @transform_0(%arg0: i32, %arg1: memref<2xf32, #tpu.memory_space<smem>>) -> (i32, i32) {
    %c0_i32 = arith.constant 0 : i32
    %c0_i32_0 = arith.constant 0 : i32
    return %arg0, %c0_i32 : i32, i32
  }
  func.func @transform_1(%arg0: i32, %arg1: memref<2xf32, #tpu.memory_space<smem>>) -> (i32, i32) {
    %c0_i32 = arith.constant 0 : i32
    %c0_i32_0 = arith.constant 0 : i32
    return %arg0, %c0_i32 : i32, i32
  }
  func.func @transform_2(%arg0: i32, %arg1: memref<2xf32, #tpu.memory_space<smem>>) -> (i32, i32) {
    %c0_i32 = arith.constant 0 : i32
    %c0_i32_0 = arith.constant 0 : i32
    return %arg0, %c0_i32 : i32, i32
  }
}

</mosaic_0001>

<bundles_post_ra>
// kernel: tpu_custom_call.1
= control target key start
LH: loop header
LB: loop body
LE: loop exit
PB: predicated region body
PF: predicated region fallthrough
CT: control target
= control target key end

     0   :  { %s2103_s15 = smov [#allocation3]   ;;  %s3595_s0 = inlined_call_operand.hbm [shape: f32[2], index: 0, kind: input, shape index: {}]   ;;  %s3596_s1 = inlined_call_operand.hbm [shape: f32[512,1024], index: 1, kind: input, shape index: {}]   ;;  %s3597_s2 = inlined_call_operand.hbm [shape: f32[512,1024], index: 2, kind: input, shape index: {}]   ;;  %s3598_s3 = inlined_call_operand.hbm [shape: f32[512,1024], index: 3, kind: output, shape index: {}]  }
   0x1   :  { %s9_s14 = sshll.u32 %s3595_s0, 4  ;;  %s10_s14 = int_to_ptr.hbm [resolvable:$true] %s9_s14 }
   0x2   :  { %12 = dma.hbm_to_smem %s10_s14, 16, %s2103_s15, [#allocation2] }
   0x3   :  { %2073 = dma.done.wait [#allocation2], 16 }
   0x4   :  { %2074 = vsyncadd [#allocation2], 4294967280 }
   0x5   :  { %15 = sfence }
   0x6   :  { %16 = vsyncpa [#allocation5], 0 }
   0x7   :  { %18 = vsyncpa [#allocation5 + $0x1], 0 }
   0x8   :  { %19 = vsyncpa [#allocation8], 0 }
   0x9   :  { %21 = vsyncpa [#allocation8 + $0x1], 0 }
   0xa   :  { %22 = vsyncpa [#allocation6], 0 }
   0xb   :  { %24 = vsyncpa [#allocation6 + $0x1], 0  ;;  %s2131_s16 = smov 0   ;;  %s2133_s17 = smov 0  }
   0xc   :  { %s2135_s18 = smov 0   ;;  %s2137_s19 = smov 0  }
   0xd LB: > { %s2152_s0 = sadd.s32 4294967295, %s2101_s19   ;;  %s1873_s20 = sadd.s32 4294967294, %s2101_s19   ;;  %s2101_s19 = sphi %s2137_s19, %s3609_s19   ;;  %s2097_s18 = sphi %s2135_s18, %s3608_s18   ;;  %s2093_s17 = sphi %s2133_s17, %s3607_s17   ;;  %s2089_s16 = sphi %s2131_s16, %s3606_s16  }
   0xe   : > { %s2156_s21 = sadd.s32 1, %s2101_s19   ;;  %s37_s22 = sadd.s32 1, %s2097_s18 }
   0xf   : > { %s34_s23 = ssub.s32 %s2101_s19, %s2156_s21  ;;  %p44_p0 = scmp.ne.s32.totalorder %s2097_s18, %s2093_s17 }
  0x10   : > { %p35_p1 = scmp.eq.s32.totalorder %s34_s23, 0  ;;  %p45_p2 = scmp.eq.s32.totalorder %s2101_s19, 0 }
  0x11   : > { %p50_p3 = scmp.ne.s32.totalorder %s2093_s17, %s2089_s16  ;;  %p51_p4 = scmp.eq.s32.totalorder %s2152_s0, 0 }
  0x12   : > { %s2168_s24 = scalar_select %p35_p1, %s2097_s18, %s37_s22  }
  0x13   : > { %p2170_p5 = por %p45_p2, %p44_p0  ;;  %p2174_p6 = por %p51_p4, %p50_p3 }
  0x14   : > { %p100_p7 = scmp.eq.s32.totalorder %s2152_s0, 1  ;;  %p106_p8 = scmp.eq.s32.totalorder %s1873_s20, 1 }
  0x15   : > { %p1918_p10 = scmp.lt.s32.totalorder %s2101_s19, 2  ;;  %s2190_s29 = sand.u32 1, %s2097_s18  }
  0x16   : > { %p2181_p11 = por %p100_p7, %p44_p0  ;;  %p2185_p12 = por %p106_p8, %p50_p3 }
  0x17   : > { %s1896_s30 = sshll.u32 %s2101_s19, 11  ;;  %s1876_s4 = sshll.u32 %s2190_s29, 11 }
  0x18   : > { %s136_s7 = scalar_lea.hbm %s3596_s1, %s1896_s30  ;;  %s130_s9 = scalar_lea.vmem [#allocation4], %s1876_s4 }
  0x19   : > { %s137_s8 = sshll.u32 %s136_s7, 4  ;;  %s139_s10 = sshll.u32 %s130_s9, 4  ;;  %s138_s8 = int_to_ptr.hbm [resolvable:$true] %s137_s8  ;;  %s140_s10 = int_to_ptr.vmem [resolvable:$true] %s139_s10 }
  0x1a   : > { %p2203_p13 = pnand %p1918_p10, %p2170_p5  ;;  %p1884_p0 = scmp.ge.s32.totalorder %s2101_s19, 1 }
  0x1b   : > { %p170_p1 = scmp.lt.s32.totalorder %s2101_s19, 3  ;;  %s127_s12 = scalar_lea.sflag [#allocation5], %s2190_s29 }
  0x1c   : > { %s1969_s13 = sshra.s32 %s138_s8, 4  ;;  %p1973_p3 = pneg %p2203_p13  ;;  %s1970_s13 = int_to_ptr.hbm [resolvable:$true] %s1969_s13 }
  0x1d   : > { %s1971_s14 = scalar_lea.hbm %s1970_s13, 2048  ;;  %s1976_s22 = scalar_lea.hbm %s3596_s1, 4096 }
  0x1e   : > { %p1972_p2 = scmp.ne.s32.totalorder %s1970_s13, %s1971_s14  ;;  %p1977_p5 = scmp.lt.s32.totalorder %s1970_s13, %s3596_s1 }
  0x1f   : > { %p1978_p8 = scmp.lt.s32.totalorder %s1976_s22, %s1971_s14 }
  0x20   : > { %p1974_p4 = pnand %p1973_p3, %p1972_p2 }
  0x21   : > { %p1979_p10 = por %p1978_p8, %p1977_p5 }
  0x22   : > { %p1975_p7 = pneg %p1974_p4 }
  0x24   : > { %p1980_p9 = pnand %p1979_p10, %p1975_p7 }
  0x26   : > { %1983 = shalt.err (!%p1980_p9)
}
  0x27   : > { %s2104_s5 = smov 1024   ;;  %s2105_s6 = smov 64  }
  0x28   : > { %1910 = dma.hbm_to_vmem [thread:$0]  (!%p2203_p13), %s138_s8, 32768, %s140_s10, %s127_s12, %s2104_s5, %s2104_s5, %s2105_s6  }
  0x29   : > { %p2227_p2 = pnand %p1884_p0, %p170_p1  ;;  %s159_s14 = scalar_lea.hbm %s3597_s2, %s1896_s30 }
  0x2a   : > { %s160_s15 = sshll.u32 %s159_s14, 4  ;;  %s153_s20 = scalar_lea.vmem [#allocation7], %s1876_s4  ;;  %s161_s15 = int_to_ptr.hbm [resolvable:$true] %s160_s15 }
  0x2b   : > { %s162_s22 = sshll.u32 %s153_s20, 4  ;;  %s150_s23 = scalar_lea.sflag [#allocation8], %s2190_s29  ;;  %s163_s22 = int_to_ptr.vmem [resolvable:$true] %s162_s22 }
  0x2c   : > { %s1999_s25 = sshra.s32 %s161_s15, 4  ;;  %s2006_s9 = scalar_lea.hbm %s3597_s2, 4096  ;;  %s2000_s25 = int_to_ptr.hbm [resolvable:$true] %s1999_s25 }
  0x2d   : > { %s2001_s8 = scalar_lea.hbm %s2000_s25, 2048  ;;  %p2007_p4 = scmp.lt.s32.totalorder %s2000_s25, %s3597_s2 }
  0x2e   : > { %p2002_p9 = scmp.ne.s32.totalorder %s2000_s25, %s2001_s8  ;;  %p2008_p7 = scmp.lt.s32.totalorder %s2006_s9, %s2001_s8 }
  0x30   : > { %p2004_p0 = pnand %p2002_p9, %p1973_p3  ;;  %p2009_p5 = por %p2008_p7, %p2007_p4 }
  0x32   : > { %p2005_p1 = pneg %p2004_p0 }
  0x34   : > { %p2010_p8 = pnand %p2009_p5, %p2005_p1 }
  0x36   : > { %2013 = shalt.err (!%p2010_p8)
}
  0x37   : > { %1913 = dma.hbm_to_vmem [thread:$0]  (!%p2203_p13), %s161_s15, 32768, %s163_s22, %s150_s23, %s2104_s5, %s2104_s5, %s2105_s6  }
  0x38   : > { %174 = sbr.rel (%p2227_p2) target bundleno = 335 (0x14f), region = 28  ;;  %s2253_s29 = sand.u32 (!%p2227_p2), 1, %s2093_s17  }
  0x39   : > { %s2256_s4 = sshll.u32 (!%p2227_p2), %s2253_s29, 11  ;;  %s177_s14 = scalar_lea.sflag (!%p2227_p2), [#allocation5], %s2253_s29 }
  0x3a   : > { %s2260_s20 = scalar_lea.vmem (!%p2227_p2), [#allocation4], %s2256_s4 }
  0x3d   : > { %2076 = dma.done.wait (%p2174_p6), %s177_s14, 32768  }
  0x3e   : > { %2078 = vsyncadd (%p2174_p6), %s177_s14, 4294934528  ;;  %s187_s11 = scalar_lea.sflag [#allocation8], %s2253_s29  ;;  %s2268_s5 = scalar_lea.vmem [#allocation7], %s2256_s4 }
  0x3f   : > { %2080 = dma.done.wait (%p2174_p6), %s187_s11, 32768  }
  0x40   : > { %2082 = vsyncadd (%p2174_p6), %s187_s11, 4294934528  ;;  %s220_s6 = sld [smem:[#allocation3]]  ;;  %v222_v0 = vld [vmem:[%s2260_s20] sm:$0xff]  ;;  %v223_v3 = vld [vmem:[%s2260_s20 + $0x8] sm:$0xff]  ;;  %s2310_s26 = scalar_lea.vmem [#allocation9], %s2256_s4 }
  0x41   : > { %s1888_s7 = sld [smem:[#allocation3 + $0x1]]  ;;  %v478_v1 = vld [vmem:[%s2268_s5] sm:$0xff]  ;;  %v479_v6 = vld [vmem:[%s2268_s5 + $0x8] sm:$0xff]  ;;  %v224_v8 = vld [vmem:[%s2260_s20 + $0x10] sm:$0xff]  ;;  %s1900_s15 = sshll.u32 %s2152_s0, 11 }
  0x42   : > { %v480_v9 = vld [vmem:[%s2268_s5 + $0x10] sm:$0xff]  ;;  %v225_v14 = vld [vmem:[%s2260_s20 + $0x18] sm:$0xff]  ;;  %v226_v16 = vld [vmem:[%s2260_s20 + $0x20] sm:$0xff]  ;;  %s1773_s23 = scalar_lea.hbm %s3598_s3, %s1900_s15  ;;  %s1774_s25 = sshll.u32 %s2310_s26, 4  ;;  %s1775_s25 = int_to_ptr.vmem [resolvable:$true] %s1774_s25 }
  0x43   : > { %v481_v15 = vld [vmem:[%s2268_s5 + $0x18] sm:$0xff]  ;;  %v482_v19 = vld [vmem:[%s2268_s5 + $0x20] sm:$0xff]  ;;  %v227_v21 = vld [vmem:[%s2260_s20 + $0x28] sm:$0xff]  ;;  %s1776_s8 = sshll.u32 %s1773_s23, 4  ;;  %s1761_s10 = scalar_lea.sflag [#allocation6], %s2253_s29  ;;  %s1777_s8 = int_to_ptr.hbm [resolvable:$true] %s1776_s8 }
  0x44   : > { %v483_v22 = vld [vmem:[%s2268_s5 + $0x28] sm:$0xff]  ;;  %v228_v27 = vld [vmem:[%s2260_s20 + $0x30] sm:$0xff]  ;;  %v229_v29 = vld [vmem:[%s2260_s20 + $0x38] sm:$0xff]  ;;  %s2043_s12 = sshra.s32 %s1777_s8, 4  ;;  %s2049_s4 = scalar_lea.hbm %s3598_s3, 4096  ;;  %s2044_s12 = int_to_ptr.hbm [resolvable:$true] %s2043_s12 }
  0x45   : > { %v484_v28 = vld [vmem:[%s2268_s5 + $0x30] sm:$0xff]  ;;  %v485_v34 = vld [vmem:[%s2268_s5 + $0x38] sm:$0xff]  ;;  %v230_v35 = vld [vmem:[%s2260_s20 + $0x40] sm:$0xff]  ;;  %s2045_s9 = scalar_lea.hbm %s2044_s12, 2048  ;;  %p2050_p10 = scmp.lt.s32.totalorder %s2044_s12, %s3598_s3 }
  0x46   : > { %v2276_v2 = vstv %s220_s6  ;;  %v486_v36 = vld [vmem:[%s2268_s5 + $0x40] sm:$0xff]  ;;  %v231_v41 = vld [vmem:[%s2260_s20 + $0x48] sm:$0xff]  ;;  %v232_v43 = vld [vmem:[%s2260_s20 + $0x50] sm:$0xff]  ;;  %p2046_p6 = scmp.ne.s32.totalorder %s2044_s12, %s2045_s9  ;;  %p2051_p2 = scmp.lt.s32.totalorder %s2049_s4, %s2045_s9 }
  0x47   : > { %v735_v4 = vmul.f32 %v2276_v2, %v222_v0  ;;  %v2280_v5 = vstv %s1888_s7  ;;  %v736_v7 = vmul.f32 %v2276_v2, %v223_v3  ;;  %v737_v12 = vmul.f32 %v2276_v2, %v224_v8  ;;  %v487_v42 = vld [vmem:[%s2268_s5 + $0x48] sm:$0xff]  ;;  %v488_v48 = vld [vmem:[%s2268_s5 + $0x50] sm:$0xff]  ;;  %v233_v49 = vld [vmem:[%s2260_s20 + $0x58] sm:$0xff] }
  0x48   : > { %v992_v10 = vmul.f32 %v2280_v5, %v478_v1  ;;  %v993_v11 = vmul.f32 %v2280_v5, %v479_v6  ;;  %v994_v13 = vmul.f32 %v2280_v5, %v480_v9  ;;  %v738_v17 = vmul.f32 %v2276_v2, %v225_v14  ;;  %v489_v50 = vld [vmem:[%s2268_s5 + $0x58] sm:$0xff]  ;;  %v234_v54 = vld [vmem:[%s2260_s20 + $0x60] sm:$0xff]  ;;  %v235_v56 = vld [vmem:[%s2260_s20 + $0x68] sm:$0xff]  ;;  %p2047_p13 = pnand %p2046_p6, %p2181_p11  ;;  %p2052_p9 = por %p2051_p2, %p2050_p10 }
  0x49   : > { %v995_v18 = vmul.f32 %v2280_v5, %v481_v15  ;;  %v739_v20 = vmul.f32 %v2276_v2, %v226_v16  ;;  %v996_v26 = vmul.f32 %v2280_v5, %v482_v19  ;;  %v740_v31 = vmul.f32 %v2276_v2, %v227_v21  ;;  %v490_v55 = vld [vmem:[%s2268_s5 + $0x60] sm:$0xff]  ;;  %v491_v61 = vld [vmem:[%s2268_s5 + $0x68] sm:$0xff]  ;;  %v236_v62 = vld [vmem:[%s2260_s20 + $0x70] sm:$0xff] }
  0x4a   : > { %v1248_v23 = vadd.f32 %v992_v10, %v735_v4  ;;  %v1249_v24 = vadd.f32 %v993_v11, %v736_v7  ;;  %v1250_v25 = vadd.f32 %v994_v13, %v737_v12  ;;  %v997_v32 = vmul.f32 %v2280_v5, %v483_v22  ;;  %v492_v63 = vld [vmem:[%s2268_s5 + $0x70] sm:$0xff]  ;;  %v237_v4 = vld [vmem:[%s2260_s20 + $0x78] sm:$0xff]  ;;  %v238_v10 = vld [vmem:[%s2260_s20 + $0x80] sm:$0xff]  ;;  %p2048_p3 = pneg %p2047_p13 }
  0x4b   : > { %v1251_v30 = vadd.f32 %v995_v18, %v738_v17  ;;  %v741_v33 = vmul.f32 %v2276_v2, %v228_v27  ;;  %v1252_v37 = vadd.f32 %v996_v26, %v739_v20  ;;  %v998_v38 = vmul.f32 %v2280_v5, %v484_v28  ;;  %v493_v6 = vld [vmem:[%s2268_s5 + $0x78] sm:$0xff]  ;;  %v494_v11 = vld [vmem:[%s2268_s5 + $0x80] sm:$0xff]  ;;  %v239_v15 = vld [vmem:[%s2260_s20 + $0x88] sm:$0xff] }
  0x4c   : > { %1504 = vst [vmem:[%s2310_s26] sm:$0xff] %v1248_v23  ;;  %v742_v39 = vmul.f32 %v2276_v2, %v229_v29  ;;  %v999_v40 = vmul.f32 %v2280_v5, %v485_v34  ;;  %v1253_v44 = vadd.f32 %v997_v32, %v740_v31  ;;  %v743_v45 = vmul.f32 %v2276_v2, %v230_v35  ;;  %v495_v16 = vld [vmem:[%s2268_s5 + $0x88] sm:$0xff]  ;;  %v240_v20 = vld [vmem:[%s2260_s20 + $0x90] sm:$0xff]  ;;  %v497_v26 = vld [vmem:[%s2268_s5 + $0x98] sm:$0xff]  ;;  %p2053_p0 = pnand %p2052_p9, %p2048_p3 }
  0x4d   : > { %1505 = vst [vmem:[%s2310_s26 + $0x8] sm:$0xff] %v1249_v24  ;;  %v1000_v46 = vmul.f32 %v2280_v5, %v486_v36  ;;  %v744_v47 = vmul.f32 %v2276_v2, %v231_v41  ;;  %v1254_v51 = vadd.f32 %v998_v38, %v741_v33  ;;  %v1001_v52 = vmul.f32 %v2280_v5, %v487_v42  ;;  %v496_v21 = vld [vmem:[%s2268_s5 + $0x90] sm:$0xff]  ;;  %v498_v31 = vld [vmem:[%s2268_s5 + $0xa0] sm:$0xff]  ;;  %v243_v35 = vld [vmem:[%s2260_s20 + $0xa8] sm:$0xff] }
  0x4e   : > { %1506 = vst [vmem:[%s2310_s26 + $0x10] sm:$0xff] %v1250_v25  ;;  %v745_v53 = vmul.f32 %v2276_v2, %v232_v43  ;;  %v1255_v57 = vadd.f32 %v999_v40, %v742_v39  ;;  %v1002_v58 = vmul.f32 %v2280_v5, %v488_v48  ;;  %v746_v59 = vmul.f32 %v2276_v2, %v233_v49  ;;  %v241_v25 = vld [vmem:[%s2260_s20 + $0x98] sm:$0xff]  ;;  %v499_v36 = vld [vmem:[%s2268_s5 + $0xa8] sm:$0xff]  ;;  %v244_v40 = vld [vmem:[%s2260_s20 + $0xb0] sm:$0xff] }
  0x4f   : > { %1507 = vst [vmem:[%s2310_s26 + $0x18] sm:$0xff] %v1251_v30  ;;  %v1003_v60 = vmul.f32 %v2280_v5, %v489_v50  ;;  %v1256_v0 = vadd.f32 %v1000_v46, %v743_v45  ;;  %v747_v1 = vmul.f32 %v2276_v2, %v234_v54  ;;  %v1004_v3 = vmul.f32 %v2280_v5, %v490_v55  ;;  %v242_v30 = vld [vmem:[%s2260_s20 + $0xa0] sm:$0xff]  ;;  %v500_v41 = vld [vmem:[%s2268_s5 + $0xb0] sm:$0xff]  ;;  %v245_v45 = vld [vmem:[%s2260_s20 + $0xb8] sm:$0xff] }
  0x50   : > { %1508 = vst [vmem:[%s2310_s26 + $0x20] sm:$0xff] %v1252_v37  ;;  %v1257_v7 = vadd.f32 %v1001_v52, %v744_v47  ;;  %v748_v8 = vmul.f32 %v2276_v2, %v235_v56  ;;  %v1005_v9 = vmul.f32 %v2280_v5, %v491_v61  ;;  %v1258_v12 = vadd.f32 %v1002_v58, %v745_v53  ;;  %v501_v46 = vld [vmem:[%s2268_s5 + $0xb8] sm:$0xff]  ;;  %v246_v50 = vld [vmem:[%s2260_s20 + $0xc0] sm:$0xff]  ;;  %v247_v55 = vld [vmem:[%s2260_s20 + $0xc8] sm:$0xff] }
  0x51   : > { %1509 = vst [vmem:[%s2310_s26 + $0x28] sm:$0xff] %v1253_v44  ;;  %v749_v13 = vmul.f32 %v2276_v2, %v236_v62  ;;  %v1006_v14 = vmul.f32 %v2280_v5, %v492_v63  ;;  %v1259_v17 = vadd.f32 %v1003_v60, %v746_v59  ;;  %v750_v18 = vmul.f32 %v2276_v2, %v237_v4  ;;  %v503_v56 = vld [vmem:[%s2268_s5 + $0xc8] sm:$0xff]  ;;  %v248_v60 = vld [vmem:[%s2260_s20 + $0xd0] sm:$0xff] }
  0x52   : > { %1510 = vst [vmem:[%s2310_s26 + $0x30] sm:$0xff] %v1254_v51  ;;  %v1007_v19 = vmul.f32 %v2280_v5, %v493_v6  ;;  %v1260_v22 = vadd.f32 %v1004_v3, %v747_v1  ;;  %v751_v23 = vmul.f32 %v2276_v2, %v238_v10  ;;  %v1008_v24 = vmul.f32 %v2280_v5, %v494_v11  ;;  %v502_v51 = vld [vmem:[%s2268_s5 + $0xc0] sm:$0xff]  ;;  %v504_v61 = vld [vmem:[%s2268_s5 + $0xd0] sm:$0xff]  ;;  %v249_v1 = vld [vmem:[%s2260_s20 + $0xd8] sm:$0xff] }
  0x53   : > { %1511 = vst [vmem:[%s2310_s26 + $0x38] sm:$0xff] %v1255_v57  ;;  %v1261_v27 = vadd.f32 %v1005_v9, %v748_v8  ;;  %v752_v28 = vmul.f32 %v2276_v2, %v239_v15  ;;  %v1009_v29 = vmul.f32 %v2280_v5, %v495_v16  ;;  %v1262_v32 = vadd.f32 %v1006_v14, %v749_v13  ;;  %v505_v3 = vld [vmem:[%s2268_s5 + $0xd8] sm:$0xff]  ;;  %v250_v8 = vld [vmem:[%s2260_s20 + $0xe0] sm:$0xff]  ;;  %v251_v13 = vld [vmem:[%s2260_s20 + $0xe8] sm:$0xff] }
  0x54   : > { %1512 = vst [vmem:[%s2310_s26 + $0x40] sm:$0xff] %v1256_v0  ;;  %v753_v33 = vmul.f32 %v2276_v2, %v240_v20  ;;  %v1010_v34 = vmul.f32 %v2280_v5, %v496_v21  ;;  %v1263_v37 = vadd.f32 %v1007_v19, %v750_v18  ;;  %v754_v38 = vmul.f32 %v2276_v2, %v241_v25  ;;  %v506_v9 = vld [vmem:[%s2268_s5 + $0xe0] sm:$0xff]  ;;  %v507_v14 = vld [vmem:[%s2268_s5 + $0xe8] sm:$0xff]  ;;  %v252_v18 = vld [vmem:[%s2260_s20 + $0xf0] sm:$0xff] }
  0x55   : > { %1513 = vst [vmem:[%s2310_s26 + $0x48] sm:$0xff] %v1257_v7  ;;  %v1011_v39 = vmul.f32 %v2280_v5, %v497_v26  ;;  %v1264_v42 = vadd.f32 %v1008_v24, %v751_v23  ;;  %v755_v43 = vmul.f32 %v2276_v2, %v242_v30  ;;  %v1012_v44 = vmul.f32 %v2280_v5, %v498_v31  ;;  %v508_v19 = vld [vmem:[%s2268_s5 + $0xf0] sm:$0xff]  ;;  %v253_v23 = vld [vmem:[%s2260_s20 + $0xf8] sm:$0xff] }
  0x56   : > { %1514 = vst [vmem:[%s2310_s26 + $0x50] sm:$0xff] %v1258_v12  ;;  %v1265_v47 = vadd.f32 %v1009_v29, %v752_v28  ;;  %v756_v48 = vmul.f32 %v2276_v2, %v243_v35  ;;  %v1013_v49 = vmul.f32 %v2280_v5, %v499_v36  ;;  %v1266_v52 = vadd.f32 %v1010_v34, %v753_v33  ;;  %v509_v24 = vld [vmem:[%s2268_s5 + $0xf8] sm:$0xff]  ;;  %v254_v28 = vld [vmem:[%s2260_s20 + $0x100] sm:$0xff]  ;;  %v255_v33 = vld [vmem:[%s2260_s20 + $0x108] sm:$0xff] }
  0x57   : > { %1515 = vst [vmem:[%s2310_s26 + $0x58] sm:$0xff] %v1259_v17  ;;  %v757_v53 = vmul.f32 %v2276_v2, %v244_v40  ;;  %v1014_v54 = vmul.f32 %v2280_v5, %v500_v41  ;;  %v1267_v57 = vadd.f32 %v1011_v39, %v754_v38  ;;  %v758_v58 = vmul.f32 %v2276_v2, %v245_v45  ;;  %v510_v29 = vld [vmem:[%s2268_s5 + $0x100] sm:$0xff]  ;;  %v511_v34 = vld [vmem:[%s2268_s5 + $0x108] sm:$0xff]  ;;  %v256_v38 = vld [vmem:[%s2260_s20 + $0x110] sm:$0xff] }
  0x58   : > { %1516 = vst [vmem:[%s2310_s26 + $0x60] sm:$0xff] %v1260_v22  ;;  %v1015_v59 = vmul.f32 %v2280_v5, %v501_v46  ;;  %v1268_v62 = vadd.f32 %v1012_v44, %v755_v43  ;;  %v759_v63 = vmul.f32 %v2276_v2, %v246_v50  ;;  %v1016_v0 = vmul.f32 %v2280_v5, %v502_v51  ;;  %v512_v39 = vld [vmem:[%s2268_s5 + $0x110] sm:$0xff]  ;;  %v257_v43 = vld [vmem:[%s2260_s20 + $0x118] sm:$0xff] }
  0x59   : > { %1517 = vst [vmem:[%s2310_s26 + $0x68] sm:$0xff] %v1261_v27  ;;  %v1269_v4 = vadd.f32 %v1013_v49, %v756_v48  ;;  %v760_v6 = vmul.f32 %v2276_v2, %v247_v55  ;;  %v1017_v7 = vmul.f32 %v2280_v5, %v503_v56  ;;  %v1270_v10 = vadd.f32 %v1014_v54, %v757_v53  ;;  %v513_v44 = vld [vmem:[%s2268_s5 + $0x118] sm:$0xff]  ;;  %v258_v48 = vld [vmem:[%s2260_s20 + $0x120] sm:$0xff]  ;;  %v259_v53 = vld [vmem:[%s2260_s20 + $0x128] sm:$0xff] }
  0x5a   : > { %1518 = vst [vmem:[%s2310_s26 + $0x70] sm:$0xff] %v1262_v32  ;;  %v761_v11 = vmul.f32 %v2276_v2, %v248_v60  ;;  %v1018_v12 = vmul.f32 %v2280_v5, %v504_v61  ;;  %v1271_v15 = vadd.f32 %v1015_v59, %v758_v58  ;;  %v762_v16 = vmul.f32 %v2276_v2, %v249_v1  ;;  %v514_v49 = vld [vmem:[%s2268_s5 + $0x120] sm:$0xff]  ;;  %v515_v54 = vld [vmem:[%s2268_s5 + $0x128] sm:$0xff]  ;;  %v260_v58 = vld [vmem:[%s2260_s20 + $0x130] sm:$0xff] }
  0x5b   : > { %1519 = vst [vmem:[%s2310_s26 + $0x78] sm:$0xff] %v1263_v37  ;;  %v1019_v17 = vmul.f32 %v2280_v5, %v505_v3  ;;  %v1272_v20 = vadd.f32 %v1016_v0, %v759_v63  ;;  %v763_v21 = vmul.f32 %v2276_v2, %v250_v8  ;;  %v1020_v22 = vmul.f32 %v2280_v5, %v506_v9  ;;  %v516_v59 = vld [vmem:[%s2268_s5 + $0x130] sm:$0xff]  ;;  %v261_v63 = vld [vmem:[%s2260_s20 + $0x138] sm:$0xff] }
  0x5c   : > { %1520 = vst [vmem:[%s2310_s26 + $0x80] sm:$0xff] %v1264_v42  ;;  %v1273_v25 = vadd.f32 %v1017_v7, %v760_v6  ;;  %v764_v26 = vmul.f32 %v2276_v2, %v251_v13  ;;  %v1021_v27 = vmul.f32 %v2280_v5, %v507_v14  ;;  %v1274_v30 = vadd.f32 %v1018_v12, %v761_v11  ;;  %v517_v0 = vld [vmem:[%s2268_s5 + $0x138] sm:$0xff]  ;;  %v262_v6 = vld [vmem:[%s2260_s20 + $0x140] sm:$0xff]  ;;  %v263_v11 = vld [vmem:[%s2260_s20 + $0x148] sm:$0xff] }
  0x5d   : > { %1521 = vst [vmem:[%s2310_s26 + $0x88] sm:$0xff] %v1265_v47  ;;  %v765_v31 = vmul.f32 %v2276_v2, %v252_v18  ;;  %v1022_v32 = vmul.f32 %v2280_v5, %v508_v19  ;;  %v1275_v35 = vadd.f32 %v1019_v17, %v762_v16  ;;  %v766_v36 = vmul.f32 %v2276_v2, %v253_v23  ;;  %v518_v7 = vld [vmem:[%s2268_s5 + $0x140] sm:$0xff]  ;;  %v519_v12 = vld [vmem:[%s2268_s5 + $0x148] sm:$0xff]  ;;  %v264_v16 = vld [vmem:[%s2260_s20 + $0x150] sm:$0xff] }
  0x5e   : > { %1522 = vst [vmem:[%s2310_s26 + $0x90] sm:$0xff] %v1266_v52  ;;  %v1023_v37 = vmul.f32 %v2280_v5, %v509_v24  ;;  %v1276_v40 = vadd.f32 %v1020_v22, %v763_v21  ;;  %v767_v41 = vmul.f32 %v2276_v2, %v254_v28  ;;  %v1024_v42 = vmul.f32 %v2280_v5, %v510_v29  ;;  %v520_v17 = vld [vmem:[%s2268_s5 + $0x150] sm:$0xff]  ;;  %v265_v21 = vld [vmem:[%s2260_s20 + $0x158] sm:$0xff] }
  0x5f   : > { %1523 = vst [vmem:[%s2310_s26 + $0x98] sm:$0xff] %v1267_v57  ;;  %v1277_v45 = vadd.f32 %v1021_v27, %v764_v26  ;;  %v768_v46 = vmul.f32 %v2276_v2, %v255_v33  ;;  %v1025_v47 = vmul.f32 %v2280_v5, %v511_v34  ;;  %v1278_v50 = vadd.f32 %v1022_v32, %v765_v31  ;;  %v521_v22 = vld [vmem:[%s2268_s5 + $0x158] sm:$0xff]  ;;  %v266_v26 = vld [vmem:[%s2260_s20 + $0x160] sm:$0xff]  ;;  %v267_v31 = vld [vmem:[%s2260_s20 + $0x168] sm:$0xff] }
  0x60   : > { %1524 = vst [vmem:[%s2310_s26 + $0xa0] sm:$0xff] %v1268_v62  ;;  %v769_v51 = vmul.f32 %v2276_v2, %v256_v38  ;;  %v1026_v52 = vmul.f32 %v2280_v5, %v512_v39  ;;  %v1279_v55 = vadd.f32 %v1023_v37, %v766_v36  ;;  %v770_v56 = vmul.f32 %v2276_v2, %v257_v43  ;;  %v522_v27 = vld [vmem:[%s2268_s5 + $0x160] sm:$0xff]  ;;  %v523_v32 = vld [vmem:[%s2268_s5 + $0x168] sm:$0xff]  ;;  %v268_v36 = vld [vmem:[%s2260_s20 + $0x170] sm:$0xff] }
  0x61   : > { %1525 = vst [vmem:[%s2310_s26 + $0xa8] sm:$0xff] %v1269_v4  ;;  %v1027_v57 = vmul.f32 %v2280_v5, %v513_v44  ;;  %v1280_v60 = vadd.f32 %v1024_v42, %v767_v41  ;;  %v771_v61 = vmul.f32 %v2276_v2, %v258_v48  ;;  %v1028_v62 = vmul.f32 %v2280_v5, %v514_v49  ;;  %v524_v37 = vld [vmem:[%s2268_s5 + $0x170] sm:$0xff]  ;;  %v269_v41 = vld [vmem:[%s2260_s20 + $0x178] sm:$0xff] }
  0x62   : > { %1526 = vst [vmem:[%s2310_s26 + $0xb0] sm:$0xff] %v1270_v10  ;;  %v1281_v1 = vadd.f32 %v1025_v47, %v768_v46  ;;  %v772_v3 = vmul.f32 %v2276_v2, %v259_v53  ;;  %v1029_v4 = vmul.f32 %v2280_v5, %v515_v54  ;;  %v1282_v8 = vadd.f32 %v1026_v52, %v769_v51  ;;  %v525_v42 = vld [vmem:[%s2268_s5 + $0x178] sm:$0xff]  ;;  %v270_v46 = vld [vmem:[%s2260_s20 + $0x180] sm:$0xff]  ;;  %v271_v51 = vld [vmem:[%s2260_s20 + $0x188] sm:$0xff] }
  0x63   : > { %1527 = vst [vmem:[%s2310_s26 + $0xb8] sm:$0xff] %v1271_v15  ;;  %v773_v9 = vmul.f32 %v2276_v2, %v260_v58  ;;  %v1030_v10 = vmul.f32 %v2280_v5, %v516_v59  ;;  %v1283_v13 = vadd.f32 %v1027_v57, %v770_v56  ;;  %v774_v14 = vmul.f32 %v2276_v2, %v261_v63  ;;  %v526_v47 = vld [vmem:[%s2268_s5 + $0x180] sm:$0xff]  ;;  %v527_v52 = vld [vmem:[%s2268_s5 + $0x188] sm:$0xff]  ;;  %v272_v56 = vld [vmem:[%s2260_s20 + $0x190] sm:$0xff] }
  0x64   : > { %1528 = vst [vmem:[%s2310_s26 + $0xc0] sm:$0xff] %v1272_v20  ;;  %v1031_v15 = vmul.f32 %v2280_v5, %v517_v0  ;;  %v1284_v18 = vadd.f32 %v1028_v62, %v771_v61  ;;  %v775_v19 = vmul.f32 %v2276_v2, %v262_v6  ;;  %v1032_v20 = vmul.f32 %v2280_v5, %v518_v7  ;;  %v528_v57 = vld [vmem:[%s2268_s5 + $0x190] sm:$0xff]  ;;  %v273_v61 = vld [vmem:[%s2260_s20 + $0x198] sm:$0xff] }
  0x65   : > { %1529 = vst [vmem:[%s2310_s26 + $0xc8] sm:$0xff] %v1273_v25  ;;  %v1285_v23 = vadd.f32 %v1029_v4, %v772_v3  ;;  %v776_v24 = vmul.f32 %v2276_v2, %v263_v11  ;;  %v1033_v25 = vmul.f32 %v2280_v5, %v519_v12  ;;  %v1286_v28 = vadd.f32 %v1030_v10, %v773_v9  ;;  %v529_v62 = vld [vmem:[%s2268_s5 + $0x198] sm:$0xff]  ;;  %v274_v3 = vld [vmem:[%s2260_s20 + $0x1a0] sm:$0xff]  ;;  %v275_v9 = vld [vmem:[%s2260_s20 + $0x1a8] sm:$0xff] }
  0x66   : > { %1530 = vst [vmem:[%s2310_s26 + $0xd0] sm:$0xff] %v1274_v30  ;;  %v777_v29 = vmul.f32 %v2276_v2, %v264_v16  ;;  %v1034_v30 = vmul.f32 %v2280_v5, %v520_v17  ;;  %v1287_v33 = vadd.f32 %v1031_v15, %v774_v14  ;;  %v778_v34 = vmul.f32 %v2276_v2, %v265_v21  ;;  %v530_v4 = vld [vmem:[%s2268_s5 + $0x1a0] sm:$0xff]  ;;  %v531_v10 = vld [vmem:[%s2268_s5 + $0x1a8] sm:$0xff]  ;;  %v276_v14 = vld [vmem:[%s2260_s20 + $0x1b0] sm:$0xff] }
  0x67   : > { %1531 = vst [vmem:[%s2310_s26 + $0xd8] sm:$0xff] %v1275_v35  ;;  %v1035_v35 = vmul.f32 %v2280_v5, %v521_v22  ;;  %v1288_v38 = vadd.f32 %v1032_v20, %v775_v19  ;;  %v779_v39 = vmul.f32 %v2276_v2, %v266_v26  ;;  %v1289_v43 = vadd.f32 %v1033_v25, %v776_v24  ;;  %v532_v15 = vld [vmem:[%s2268_s5 + $0x1b0] sm:$0xff]  ;;  %v277_v19 = vld [vmem:[%s2260_s20 + $0x1b8] sm:$0xff]  ;;  %v278_v24 = vld [vmem:[%s2260_s20 + $0x1c0] sm:$0xff] }
  0x68   : > { %1532 = vst [vmem:[%s2310_s26 + $0xe0] sm:$0xff] %v1276_v40  ;;  %v1036_v40 = vmul.f32 %v2280_v5, %v522_v27  ;;  %v780_v44 = vmul.f32 %v2276_v2, %v267_v31  ;;  %v1290_v48 = vadd.f32 %v1034_v30, %v777_v29  ;;  %v781_v49 = vmul.f32 %v2276_v2, %v268_v36  ;;  %v533_v20 = vld [vmem:[%s2268_s5 + $0x1b8] sm:$0xff]  ;;  %v534_v25 = vld [vmem:[%s2268_s5 + $0x1c0] sm:$0xff]  ;;  %v279_v29 = vld [vmem:[%s2260_s20 + $0x1c8] sm:$0xff] }
  0x69   : > { %1533 = vst [vmem:[%s2310_s26 + $0xe8] sm:$0xff] %v1277_v45  ;;  %v1037_v45 = vmul.f32 %v2280_v5, %v523_v32  ;;  %v1291_v53 = vadd.f32 %v1035_v35, %v778_v34  ;;  %v782_v54 = vmul.f32 %v2276_v2, %v269_v41  ;;  %v783_v59 = vmul.f32 %v2276_v2, %v270_v46  ;;  %v535_v30 = vld [vmem:[%s2268_s5 + $0x1c8] sm:$0xff]  ;;  %v280_v34 = vld [vmem:[%s2260_s20 + $0x1d0] sm:$0xff] }
  0x6a   : > { %1534 = vst [vmem:[%s2310_s26 + $0xf0] sm:$0xff] %v1278_v50  ;;  %v1038_v50 = vmul.f32 %v2280_v5, %v524_v37  ;;  %v1292_v58 = vadd.f32 %v1036_v40, %v779_v39  ;;  %v784_v0 = vmul.f32 %v2276_v2, %v271_v51  ;;  %v785_v7 = vmul.f32 %v2276_v2, %v272_v56  ;;  %v536_v35 = vld [vmem:[%s2268_s5 + $0x1d0] sm:$0xff]  ;;  %v281_v39 = vld [vmem:[%s2260_s20 + $0x1d8] sm:$0xff] }
  0x6b   : > { %1535 = vst [vmem:[%s2310_s26 + $0xf8] sm:$0xff] %v1279_v55  ;;  %v1039_v55 = vmul.f32 %v2280_v5, %v525_v42  ;;  %v1293_v63 = vadd.f32 %v1037_v45, %v780_v44  ;;  %v786_v12 = vmul.f32 %v2276_v2, %v273_v61  ;;  %v787_v17 = vmul.f32 %v2276_v2, %v274_v3  ;;  %v537_v40 = vld [vmem:[%s2268_s5 + $0x1d8] sm:$0xff]  ;;  %v282_v44 = vld [vmem:[%s2260_s20 + $0x1e0] sm:$0xff] }
  0x6c   : > { %1536 = vst [vmem:[%s2310_s26 + $0x100] sm:$0xff] %v1280_v60  ;;  %v1040_v60 = vmul.f32 %v2280_v5, %v526_v47  ;;  %v1294_v6 = vadd.f32 %v1038_v50, %v781_v49  ;;  %v788_v22 = vmul.f32 %v2276_v2, %v275_v9  ;;  %v789_v27 = vmul.f32 %v2276_v2, %v276_v14  ;;  %v538_v45 = vld [vmem:[%s2268_s5 + $0x1e0] sm:$0xff]  ;;  %v283_v49 = vld [vmem:[%s2260_s20 + $0x1e8] sm:$0xff] }
  0x6d   : > { %1537 = vst [vmem:[%s2310_s26 + $0x108] sm:$0xff] %v1281_v1  ;;  %v1041_v1 = vmul.f32 %v2280_v5, %v527_v52  ;;  %v1295_v11 = vadd.f32 %v1039_v55, %v782_v54  ;;  %v790_v32 = vmul.f32 %v2276_v2, %v277_v19  ;;  %v791_v37 = vmul.f32 %v2276_v2, %v278_v24  ;;  %v539_v50 = vld [vmem:[%s2268_s5 + $0x1e8] sm:$0xff]  ;;  %v284_v54 = vld [vmem:[%s2260_s20 + $0x1f0] sm:$0xff] }
  0x6e   : > { %1538 = vst [vmem:[%s2310_s26 + $0x110] sm:$0xff] %v1282_v8  ;;  %v1042_v8 = vmul.f32 %v2280_v5, %v528_v57  ;;  %v1296_v16 = vadd.f32 %v1040_v60, %v783_v59  ;;  %v792_v42 = vmul.f32 %v2276_v2, %v279_v29  ;;  %v793_v47 = vmul.f32 %v2276_v2, %v280_v34  ;;  %v540_v55 = vld [vmem:[%s2268_s5 + $0x1f0] sm:$0xff]  ;;  %v285_v59 = vld [vmem:[%s2260_s20 + $0x1f8] sm:$0xff] }
  0x6f   : > { %1539 = vst [vmem:[%s2310_s26 + $0x118] sm:$0xff] %v1283_v13  ;;  %v1043_v13 = vmul.f32 %v2280_v5, %v529_v62  ;;  %v1297_v21 = vadd.f32 %v1041_v1, %v784_v0  ;;  %v794_v52 = vmul.f32 %v2276_v2, %v281_v39  ;;  %v795_v57 = vmul.f32 %v2276_v2, %v282_v44  ;;  %v541_v60 = vld [vmem:[%s2268_s5 + $0x1f8] sm:$0xff]  ;;  %v286_v0 = vld [vmem:[%s2260_s20 + $0x200] sm:$0xff] }
  0x70   : > { %1540 = vst [vmem:[%s2310_s26 + $0x120] sm:$0xff] %v1284_v18  ;;  %v1044_v18 = vmul.f32 %v2280_v5, %v530_v4  ;;  %v1298_v26 = vadd.f32 %v1042_v8, %v785_v7  ;;  %v796_v62 = vmul.f32 %v2276_v2, %v283_v49  ;;  %v542_v1 = vld [vmem:[%s2268_s5 + $0x200] sm:$0xff]  ;;  %v797_v4 = vmul.f32 %v2276_v2, %v284_v54  ;;  %v287_v7 = vld [vmem:[%s2260_s20 + $0x208] sm:$0xff] }
  0x71   : > { %1541 = vst [vmem:[%s2310_s26 + $0x128] sm:$0xff] %v1285_v23  ;;  %v1045_v23 = vmul.f32 %v2280_v5, %v531_v10  ;;  %v1299_v31 = vadd.f32 %v1043_v13, %v786_v12  ;;  %v543_v8 = vld [vmem:[%s2268_s5 + $0x208] sm:$0xff]  ;;  %v798_v10 = vmul.f32 %v2276_v2, %v285_v59  ;;  %v288_v12 = vld [vmem:[%s2260_s20 + $0x210] sm:$0xff] }
  0x72   : > { %1542 = vst [vmem:[%s2310_s26 + $0x130] sm:$0xff] %v1286_v28  ;;  %v1046_v28 = vmul.f32 %v2280_v5, %v532_v15  ;;  %v1300_v36 = vadd.f32 %v1044_v18, %v787_v17  ;;  %v544_v13 = vld [vmem:[%s2268_s5 + $0x210] sm:$0xff]  ;;  %v799_v15 = vmul.f32 %v2276_v2, %v286_v0  ;;  %v289_v17 = vld [vmem:[%s2260_s20 + $0x218] sm:$0xff] }
  0x73   : > { %1543 = vst [vmem:[%s2310_s26 + $0x138] sm:$0xff] %v1287_v33  ;;  %v1047_v33 = vmul.f32 %v2280_v5, %v533_v20  ;;  %v1301_v41 = vadd.f32 %v1045_v23, %v788_v22  ;;  %v545_v18 = vld [vmem:[%s2268_s5 + $0x218] sm:$0xff]  ;;  %v800_v20 = vmul.f32 %v2276_v2, %v287_v7  ;;  %v290_v22 = vld [vmem:[%s2260_s20 + $0x220] sm:$0xff] }
  0x74   : > { %1544 = vst [vmem:[%s2310_s26 + $0x140] sm:$0xff] %v1288_v38  ;;  %v1048_v38 = vmul.f32 %v2280_v5, %v534_v25  ;;  %v1302_v46 = vadd.f32 %v1046_v28, %v789_v27  ;;  %v546_v23 = vld [vmem:[%s2268_s5 + $0x220] sm:$0xff]  ;;  %v801_v25 = vmul.f32 %v2276_v2, %v288_v12  ;;  %v291_v27 = vld [vmem:[%s2260_s20 + $0x228] sm:$0xff] }
  0x75   : > { %1545 = vst [vmem:[%s2310_s26 + $0x148] sm:$0xff] %v1289_v43  ;;  %v1049_v43 = vmul.f32 %v2280_v5, %v535_v30  ;;  %v1303_v51 = vadd.f32 %v1047_v33, %v790_v32  ;;  %v547_v28 = vld [vmem:[%s2268_s5 + $0x228] sm:$0xff]  ;;  %v802_v30 = vmul.f32 %v2276_v2, %v289_v17  ;;  %v292_v32 = vld [vmem:[%s2260_s20 + $0x230] sm:$0xff] }
  0x76   : > { %1546 = vst [vmem:[%s2310_s26 + $0x150] sm:$0xff] %v1290_v48  ;;  %v1050_v48 = vmul.f32 %v2280_v5, %v536_v35  ;;  %v1304_v56 = vadd.f32 %v1048_v38, %v791_v37  ;;  %v548_v33 = vld [vmem:[%s2268_s5 + $0x230] sm:$0xff]  ;;  %v803_v35 = vmul.f32 %v2276_v2, %v290_v22  ;;  %v293_v37 = vld [vmem:[%s2260_s20 + $0x238] sm:$0xff] }
  0x77   : > { %1547 = vst [vmem:[%s2310_s26 + $0x158] sm:$0xff] %v1291_v53  ;;  %v1051_v53 = vmul.f32 %v2280_v5, %v537_v40  ;;  %v1305_v61 = vadd.f32 %v1049_v43, %v792_v42  ;;  %v549_v38 = vld [vmem:[%s2268_s5 + $0x238] sm:$0xff]  ;;  %v804_v40 = vmul.f32 %v2276_v2, %v291_v27  ;;  %v294_v42 = vld [vmem:[%s2260_s20 + $0x240] sm:$0xff] }
  0x78   : > { %1548 = vst [vmem:[%s2310_s26 + $0x160] sm:$0xff] %v1292_v58  ;;  %v1052_v58 = vmul.f32 %v2280_v5, %v538_v45  ;;  %v1306_v3 = vadd.f32 %v1050_v48, %v793_v47  ;;  %v550_v43 = vld [vmem:[%s2268_s5 + $0x240] sm:$0xff]  ;;  %v805_v45 = vmul.f32 %v2276_v2, %v292_v32  ;;  %v295_v47 = vld [vmem:[%s2260_s20 + $0x248] sm:$0xff] }
  0x79   : > { %1549 = vst [vmem:[%s2310_s26 + $0x168] sm:$0xff] %v1293_v63  ;;  %v1053_v63 = vmul.f32 %v2280_v5, %v539_v50  ;;  %v1307_v9 = vadd.f32 %v1051_v53, %v794_v52  ;;  %v551_v48 = vld [vmem:[%s2268_s5 + $0x248] sm:$0xff]  ;;  %v806_v50 = vmul.f32 %v2276_v2, %v293_v37  ;;  %v296_v52 = vld [vmem:[%s2260_s20 + $0x250] sm:$0xff] }
  0x7a   : > { %1550 = vst [vmem:[%s2310_s26 + $0x170] sm:$0xff] %v1294_v6  ;;  %v1054_v6 = vmul.f32 %v2280_v5, %v540_v55  ;;  %v1308_v14 = vadd.f32 %v1052_v58, %v795_v57  ;;  %v552_v53 = vld [vmem:[%s2268_s5 + $0x250] sm:$0xff]  ;;  %v807_v55 = vmul.f32 %v2276_v2, %v294_v42  ;;  %v297_v57 = vld [vmem:[%s2260_s20 + $0x258] sm:$0xff] }
  0x7b   : > { %1551 = vst [vmem:[%s2310_s26 + $0x178] sm:$0xff] %v1295_v11  ;;  %v1055_v11 = vmul.f32 %v2280_v5, %v541_v60  ;;  %v1309_v19 = vadd.f32 %v1053_v63, %v796_v62  ;;  %v553_v58 = vld [vmem:[%s2268_s5 + $0x258] sm:$0xff]  ;;  %v808_v60 = vmul.f32 %v2276_v2, %v295_v47  ;;  %v298_v62 = vld [vmem:[%s2260_s20 + $0x260] sm:$0xff] }
  0x7c   : > { %1552 = vst [vmem:[%s2310_s26 + $0x180] sm:$0xff] %v1296_v16  ;;  %v1056_v16 = vmul.f32 %v2280_v5, %v542_v1  ;;  %v1310_v24 = vadd.f32 %v1054_v6, %v797_v4  ;;  %v554_v63 = vld [vmem:[%s2268_s5 + $0x260] sm:$0xff]  ;;  %v809_v1 = vmul.f32 %v2276_v2, %v296_v52  ;;  %v299_v4 = vld [vmem:[%s2260_s20 + $0x268] sm:$0xff] }
  0x7d   : > { %1553 = vst [vmem:[%s2310_s26 + $0x188] sm:$0xff] %v1297_v21  ;;  %v1057_v21 = vmul.f32 %v2280_v5, %v543_v8  ;;  %v1311_v29 = vadd.f32 %v1055_v11, %v798_v10  ;;  %v555_v6 = vld [vmem:[%s2268_s5 + $0x268] sm:$0xff]  ;;  %v810_v8 = vmul.f32 %v2276_v2, %v297_v57  ;;  %v300_v10 = vld [vmem:[%s2260_s20 + $0x270] sm:$0xff] }
  0x7e   : > { %1554 = vst [vmem:[%s2310_s26 + $0x190] sm:$0xff] %v1298_v26  ;;  %v1058_v26 = vmul.f32 %v2280_v5, %v544_v13  ;;  %v1312_v34 = vadd.f32 %v1056_v16, %v799_v15  ;;  %v556_v11 = vld [vmem:[%s2268_s5 + $0x270] sm:$0xff]  ;;  %v811_v13 = vmul.f32 %v2276_v2, %v298_v62  ;;  %v301_v15 = vld [vmem:[%s2260_s20 + $0x278] sm:$0xff] }
  0x7f   : > { %1555 = vst [vmem:[%s2310_s26 + $0x198] sm:$0xff] %v1299_v31  ;;  %v1059_v31 = vmul.f32 %v2280_v5, %v545_v18  ;;  %v1313_v39 = vadd.f32 %v1057_v21, %v800_v20  ;;  %v557_v16 = vld [vmem:[%s2268_s5 + $0x278] sm:$0xff]  ;;  %v812_v18 = vmul.f32 %v2276_v2, %v299_v4  ;;  %v302_v20 = vld [vmem:[%s2260_s20 + $0x280] sm:$0xff] }
  0x80   : > { %1556 = vst [vmem:[%s2310_s26 + $0x1a0] sm:$0xff] %v1300_v36  ;;  %v1060_v36 = vmul.f32 %v2280_v5, %v546_v23  ;;  %v1314_v44 = vadd.f32 %v1058_v26, %v801_v25  ;;  %v558_v21 = vld [vmem:[%s2268_s5 + $0x280] sm:$0xff]  ;;  %v813_v23 = vmul.f32 %v2276_v2, %v300_v10  ;;  %v303_v25 = vld [vmem:[%s2260_s20 + $0x288] sm:$0xff] }
  0x81   : > { %1557 = vst [vmem:[%s2310_s26 + $0x1a8] sm:$0xff] %v1301_v41  ;;  %v1061_v41 = vmul.f32 %v2280_v5, %v547_v28  ;;  %v1315_v49 = vadd.f32 %v1059_v31, %v802_v30  ;;  %v559_v26 = vld [vmem:[%s2268_s5 + $0x288] sm:$0xff]  ;;  %v814_v28 = vmul.f32 %v2276_v2, %v301_v15  ;;  %v304_v30 = vld [vmem:[%s2260_s20 + $0x290] sm:$0xff] }
  0x82   : > { %1558 = vst [vmem:[%s2310_s26 + $0x1b0] sm:$0xff] %v1302_v46  ;;  %v1062_v46 = vmul.f32 %v2280_v5, %v548_v33  ;;  %v1316_v54 = vadd.f32 %v1060_v36, %v803_v35  ;;  %v560_v31 = vld [vmem:[%s2268_s5 + $0x290] sm:$0xff]  ;;  %v815_v33 = vmul.f32 %v2276_v2, %v302_v20  ;;  %v305_v35 = vld [vmem:[%s2260_s20 + $0x298] sm:$0xff] }
  0x83   : > { %1559 = vst [vmem:[%s2310_s26 + $0x1b8] sm:$0xff] %v1303_v51  ;;  %v1063_v51 = vmul.f32 %v2280_v5, %v549_v38  ;;  %v1317_v59 = vadd.f32 %v1061_v41, %v804_v40  ;;  %v561_v36 = vld [vmem:[%s2268_s5 + $0x298] sm:$0xff]  ;;  %v816_v38 = vmul.f32 %v2276_v2, %v303_v25  ;;  %v306_v40 = vld [vmem:[%s2260_s20 + $0x2a0] sm:$0xff] }
  0x84   : > { %1560 = vst [vmem:[%s2310_s26 + $0x1c0] sm:$0xff] %v1304_v56  ;;  %v1064_v56 = vmul.f32 %v2280_v5, %v550_v43  ;;  %v1318_v0 = vadd.f32 %v1062_v46, %v805_v45  ;;  %v562_v41 = vld [vmem:[%s2268_s5 + $0x2a0] sm:$0xff]  ;;  %v817_v43 = vmul.f32 %v2276_v2, %v304_v30  ;;  %v307_v45 = vld [vmem:[%s2260_s20 + $0x2a8] sm:$0xff] }
  0x85   : > { %1561 = vst [vmem:[%s2310_s26 + $0x1c8] sm:$0xff] %v1305_v61  ;;  %v1065_v61 = vmul.f32 %v2280_v5, %v551_v48  ;;  %v1319_v7 = vadd.f32 %v1063_v51, %v806_v50  ;;  %v563_v46 = vld [vmem:[%s2268_s5 + $0x2a8] sm:$0xff]  ;;  %v818_v48 = vmul.f32 %v2276_v2, %v305_v35  ;;  %v308_v50 = vld [vmem:[%s2260_s20 + $0x2b0] sm:$0xff] }
  0x86   : > { %1562 = vst [vmem:[%s2310_s26 + $0x1d0] sm:$0xff] %v1306_v3  ;;  %v1066_v3 = vmul.f32 %v2280_v5, %v552_v53  ;;  %v1320_v12 = vadd.f32 %v1064_v56, %v807_v55  ;;  %v564_v51 = vld [vmem:[%s2268_s5 + $0x2b0] sm:$0xff]  ;;  %v819_v53 = vmul.f32 %v2276_v2, %v306_v40  ;;  %v309_v55 = vld [vmem:[%s2260_s20 + $0x2b8] sm:$0xff] }
  0x87   : > { %1563 = vst [vmem:[%s2310_s26 + $0x1d8] sm:$0xff] %v1307_v9  ;;  %v1067_v9 = vmul.f32 %v2280_v5, %v553_v58  ;;  %v1321_v17 = vadd.f32 %v1065_v61, %v808_v60  ;;  %v565_v56 = vld [vmem:[%s2268_s5 + $0x2b8] sm:$0xff]  ;;  %v820_v58 = vmul.f32 %v2276_v2, %v307_v45  ;;  %v310_v60 = vld [vmem:[%s2260_s20 + $0x2c0] sm:$0xff] }
  0x88   : > { %1564 = vst [vmem:[%s2310_s26 + $0x1e0] sm:$0xff] %v1308_v14  ;;  %v1068_v14 = vmul.f32 %v2280_v5, %v554_v63  ;;  %v1322_v22 = vadd.f32 %v1066_v3, %v809_v1  ;;  %v566_v61 = vld [vmem:[%s2268_s5 + $0x2c0] sm:$0xff]  ;;  %v821_v63 = vmul.f32 %v2276_v2, %v308_v50  ;;  %v311_v1 = vld [vmem:[%s2260_s20 + $0x2c8] sm:$0xff] }
  0x89   : > { %1565 = vst [vmem:[%s2310_s26 + $0x1e8] sm:$0xff] %v1309_v19  ;;  %v1069_v19 = vmul.f32 %v2280_v5, %v555_v6  ;;  %v1323_v27 = vadd.f32 %v1067_v9, %v810_v8  ;;  %v567_v3 = vld [vmem:[%s2268_s5 + $0x2c8] sm:$0xff]  ;;  %v822_v6 = vmul.f32 %v2276_v2, %v309_v55  ;;  %v312_v8 = vld [vmem:[%s2260_s20 + $0x2d0] sm:$0xff] }
  0x8a   : > { %1566 = vst [vmem:[%s2310_s26 + $0x1f0] sm:$0xff] %v1310_v24  ;;  %v1070_v24 = vmul.f32 %v2280_v5, %v556_v11  ;;  %v1324_v32 = vadd.f32 %v1068_v14, %v811_v13  ;;  %v568_v9 = vld [vmem:[%s2268_s5 + $0x2d0] sm:$0xff]  ;;  %v823_v11 = vmul.f32 %v2276_v2, %v310_v60  ;;  %v313_v13 = vld [vmem:[%s2260_s20 + $0x2d8] sm:$0xff] }
  0x8b   : > { %1567 = vst [vmem:[%s2310_s26 + $0x1f8] sm:$0xff] %v1311_v29  ;;  %v1071_v29 = vmul.f32 %v2280_v5, %v557_v16  ;;  %v1325_v37 = vadd.f32 %v1069_v19, %v812_v18  ;;  %v569_v14 = vld [vmem:[%s2268_s5 + $0x2d8] sm:$0xff]  ;;  %v824_v16 = vmul.f32 %v2276_v2, %v311_v1  ;;  %v314_v18 = vld [vmem:[%s2260_s20 + $0x2e0] sm:$0xff] }
  0x8c   : > { %1568 = vst [vmem:[%s2310_s26 + $0x200] sm:$0xff] %v1312_v34  ;;  %v1072_v34 = vmul.f32 %v2280_v5, %v558_v21  ;;  %v1326_v42 = vadd.f32 %v1070_v24, %v813_v23  ;;  %v570_v19 = vld [vmem:[%s2268_s5 + $0x2e0] sm:$0xff]  ;;  %v825_v21 = vmul.f32 %v2276_v2, %v312_v8  ;;  %v315_v23 = vld [vmem:[%s2260_s20 + $0x2e8] sm:$0xff] }
  0x8d   : > { %1569 = vst [vmem:[%s2310_s26 + $0x208] sm:$0xff] %v1313_v39  ;;  %v1073_v39 = vmul.f32 %v2280_v5, %v559_v26  ;;  %v1327_v47 = vadd.f32 %v1071_v29, %v814_v28  ;;  %v571_v24 = vld [vmem:[%s2268_s5 + $0x2e8] sm:$0xff]  ;;  %v826_v26 = vmul.f32 %v2276_v2, %v313_v13  ;;  %v316_v28 = vld [vmem:[%s2260_s20 + $0x2f0] sm:$0xff] }
  0x8e   : > { %1570 = vst [vmem:[%s2310_s26 + $0x210] sm:$0xff] %v1314_v44  ;;  %v1074_v44 = vmul.f32 %v2280_v5, %v560_v31  ;;  %v1328_v52 = vadd.f32 %v1072_v34, %v815_v33  ;;  %v572_v29 = vld [vmem:[%s2268_s5 + $0x2f0] sm:$0xff]  ;;  %v827_v31 = vmul.f32 %v2276_v2, %v314_v18  ;;  %v317_v33 = vld [vmem:[%s2260_s20 + $0x2f8] sm:$0xff] }
  0x8f   : > { %1571 = vst [vmem:[%s2310_s26 + $0x218] sm:$0xff] %v1315_v49  ;;  %v1075_v49 = vmul.f32 %v2280_v5, %v561_v36  ;;  %v1329_v57 = vadd.f32 %v1073_v39, %v816_v38  ;;  %v573_v34 = vld [vmem:[%s2268_s5 + $0x2f8] sm:$0xff]  ;;  %v828_v36 = vmul.f32 %v2276_v2, %v315_v23  ;;  %v318_v38 = vld [vmem:[%s2260_s20 + $0x300] sm:$0xff] }
  0x90   : > { %1572 = vst [vmem:[%s2310_s26 + $0x220] sm:$0xff] %v1316_v54  ;;  %v1076_v54 = vmul.f32 %v2280_v5, %v562_v41  ;;  %v1330_v62 = vadd.f32 %v1074_v44, %v817_v43  ;;  %v574_v39 = vld [vmem:[%s2268_s5 + $0x300] sm:$0xff]  ;;  %v829_v41 = vmul.f32 %v2276_v2, %v316_v28  ;;  %v319_v43 = vld [vmem:[%s2260_s20 + $0x308] sm:$0xff] }
  0x91   : > { %1573 = vst [vmem:[%s2310_s26 + $0x228] sm:$0xff] %v1317_v59  ;;  %v1077_v59 = vmul.f32 %v2280_v5, %v563_v46  ;;  %v1331_v4 = vadd.f32 %v1075_v49, %v818_v48  ;;  %v575_v44 = vld [vmem:[%s2268_s5 + $0x308] sm:$0xff]  ;;  %v830_v46 = vmul.f32 %v2276_v2, %v317_v33  ;;  %v320_v48 = vld [vmem:[%s2260_s20 + $0x310] sm:$0xff] }
  0x92   : > { %1574 = vst [vmem:[%s2310_s26 + $0x230] sm:$0xff] %v1318_v0  ;;  %v1078_v0 = vmul.f32 %v2280_v5, %v564_v51  ;;  %v1332_v10 = vadd.f32 %v1076_v54, %v819_v53  ;;  %v576_v49 = vld [vmem:[%s2268_s5 + $0x310] sm:$0xff]  ;;  %v831_v51 = vmul.f32 %v2276_v2, %v318_v38  ;;  %v321_v53 = vld [vmem:[%s2260_s20 + $0x318] sm:$0xff] }
  0x93   : > { %1575 = vst [vmem:[%s2310_s26 + $0x238] sm:$0xff] %v1319_v7  ;;  %v1079_v7 = vmul.f32 %v2280_v5, %v565_v56  ;;  %v1333_v15 = vadd.f32 %v1077_v59, %v820_v58  ;;  %v577_v54 = vld [vmem:[%s2268_s5 + $0x318] sm:$0xff]  ;;  %v832_v56 = vmul.f32 %v2276_v2, %v319_v43  ;;  %v322_v58 = vld [vmem:[%s2260_s20 + $0x320] sm:$0xff] }
  0x94   : > { %1576 = vst [vmem:[%s2310_s26 + $0x240] sm:$0xff] %v1320_v12  ;;  %v1080_v12 = vmul.f32 %v2280_v5, %v566_v61  ;;  %v1334_v20 = vadd.f32 %v1078_v0, %v821_v63  ;;  %v578_v59 = vld [vmem:[%s2268_s5 + $0x320] sm:$0xff]  ;;  %v833_v61 = vmul.f32 %v2276_v2, %v320_v48  ;;  %v323_v63 = vld [vmem:[%s2260_s20 + $0x328] sm:$0xff] }
  0x95   : > { %1577 = vst [vmem:[%s2310_s26 + $0x248] sm:$0xff] %v1321_v17  ;;  %v1081_v17 = vmul.f32 %v2280_v5, %v567_v3  ;;  %v1335_v25 = vadd.f32 %v1079_v7, %v822_v6  ;;  %v579_v0 = vld [vmem:[%s2268_s5 + $0x328] sm:$0xff]  ;;  %v834_v3 = vmul.f32 %v2276_v2, %v321_v53  ;;  %v324_v6 = vld [vmem:[%s2260_s20 + $0x330] sm:$0xff] }
  0x96   : > { %1578 = vst [vmem:[%s2310_s26 + $0x250] sm:$0xff] %v1322_v22  ;;  %v1082_v22 = vmul.f32 %v2280_v5, %v568_v9  ;;  %v1336_v30 = vadd.f32 %v1080_v12, %v823_v11  ;;  %v580_v7 = vld [vmem:[%s2268_s5 + $0x330] sm:$0xff]  ;;  %v835_v9 = vmul.f32 %v2276_v2, %v322_v58  ;;  %v325_v11 = vld [vmem:[%s2260_s20 + $0x338] sm:$0xff] }
  0x97   : > { %1579 = vst [vmem:[%s2310_s26 + $0x258] sm:$0xff] %v1323_v27  ;;  %v1083_v27 = vmul.f32 %v2280_v5, %v569_v14  ;;  %v1337_v35 = vadd.f32 %v1081_v17, %v824_v16  ;;  %v581_v12 = vld [vmem:[%s2268_s5 + $0x338] sm:$0xff]  ;;  %v836_v14 = vmul.f32 %v2276_v2, %v323_v63  ;;  %v326_v16 = vld [vmem:[%s2260_s20 + $0x340] sm:$0xff] }
  0x98   : > { %1580 = vst [vmem:[%s2310_s26 + $0x260] sm:$0xff] %v1324_v32  ;;  %v1084_v32 = vmul.f32 %v2280_v5, %v570_v19  ;;  %v1338_v40 = vadd.f32 %v1082_v22, %v825_v21  ;;  %v582_v17 = vld [vmem:[%s2268_s5 + $0x340] sm:$0xff]  ;;  %v837_v19 = vmul.f32 %v2276_v2, %v324_v6  ;;  %v327_v21 = vld [vmem:[%s2260_s20 + $0x348] sm:$0xff] }
  0x99   : > { %1581 = vst [vmem:[%s2310_s26 + $0x268] sm:$0xff] %v1325_v37  ;;  %v1085_v37 = vmul.f32 %v2280_v5, %v571_v24  ;;  %v1339_v45 = vadd.f32 %v1083_v27, %v826_v26  ;;  %v583_v22 = vld [vmem:[%s2268_s5 + $0x348] sm:$0xff]  ;;  %v838_v24 = vmul.f32 %v2276_v2, %v325_v11  ;;  %v328_v26 = vld [vmem:[%s2260_s20 + $0x350] sm:$0xff] }
  0x9a   : > { %1582 = vst [vmem:[%s2310_s26 + $0x270] sm:$0xff] %v1326_v42  ;;  %v1086_v42 = vmul.f32 %v2280_v5, %v572_v29  ;;  %v1340_v50 = vadd.f32 %v1084_v32, %v827_v31  ;;  %v584_v27 = vld [vmem:[%s2268_s5 + $0x350] sm:$0xff]  ;;  %v839_v29 = vmul.f32 %v2276_v2, %v326_v16  ;;  %v329_v31 = vld [vmem:[%s2260_s20 + $0x358] sm:$0xff] }
  0x9b   : > { %1583 = vst [vmem:[%s2310_s26 + $0x278] sm:$0xff] %v1327_v47  ;;  %v1087_v47 = vmul.f32 %v2280_v5, %v573_v34  ;;  %v1341_v55 = vadd.f32 %v1085_v37, %v828_v36  ;;  %v585_v32 = vld [vmem:[%s2268_s5 + $0x358] sm:$0xff]  ;;  %v840_v34 = vmul.f32 %v2276_v2, %v327_v21  ;;  %v330_v36 = vld [vmem:[%s2260_s20 + $0x360] sm:$0xff] }
  0x9c   : > { %1584 = vst [vmem:[%s2310_s26 + $0x280] sm:$0xff] %v1328_v52  ;;  %v1088_v52 = vmul.f32 %v2280_v5, %v574_v39  ;;  %v1342_v60 = vadd.f32 %v1086_v42, %v829_v41  ;;  %v586_v37 = vld [vmem:[%s2268_s5 + $0x360] sm:$0xff]  ;;  %v841_v39 = vmul.f32 %v2276_v2, %v328_v26  ;;  %v331_v41 = vld [vmem:[%s2260_s20 + $0x368] sm:$0xff] }
  0x9d   : > { %1585 = vst [vmem:[%s2310_s26 + $0x288] sm:$0xff] %v1329_v57  ;;  %v1089_v57 = vmul.f32 %v2280_v5, %v575_v44  ;;  %v1343_v1 = vadd.f32 %v1087_v47, %v830_v46  ;;  %v587_v42 = vld [vmem:[%s2268_s5 + $0x368] sm:$0xff]  ;;  %v842_v44 = vmul.f32 %v2276_v2, %v329_v31  ;;  %v332_v46 = vld [vmem:[%s2260_s20 + $0x370] sm:$0xff] }
  0x9e   : > { %1586 = vst [vmem:[%s2310_s26 + $0x290] sm:$0xff] %v1330_v62  ;;  %v1090_v62 = vmul.f32 %v2280_v5, %v576_v49  ;;  %v1344_v8 = vadd.f32 %v1088_v52, %v831_v51  ;;  %v588_v47 = vld [vmem:[%s2268_s5 + $0x370] sm:$0xff]  ;;  %v843_v49 = vmul.f32 %v2276_v2, %v330_v36  ;;  %v333_v51 = vld [vmem:[%s2260_s20 + $0x378] sm:$0xff] }
  0x9f   : > { %1587 = vst [vmem:[%s2310_s26 + $0x298] sm:$0xff] %v1331_v4  ;;  %v1091_v4 = vmul.f32 %v2280_v5, %v577_v54  ;;  %v1345_v13 = vadd.f32 %v1089_v57, %v832_v56  ;;  %v589_v52 = vld [vmem:[%s2268_s5 + $0x378] sm:$0xff]  ;;  %v844_v54 = vmul.f32 %v2276_v2, %v331_v41  ;;  %v334_v56 = vld [vmem:[%s2260_s20 + $0x380] sm:$0xff] }
  0xa0   : > { %1588 = vst [vmem:[%s2310_s26 + $0x2a0] sm:$0xff] %v1332_v10  ;;  %v1092_v10 = vmul.f32 %v2280_v5, %v578_v59  ;;  %v1346_v18 = vadd.f32 %v1090_v62, %v833_v61  ;;  %v590_v57 = vld [vmem:[%s2268_s5 + $0x380] sm:$0xff]  ;;  %v845_v59 = vmul.f32 %v2276_v2, %v332_v46  ;;  %v335_v61 = vld [vmem:[%s2260_s20 + $0x388] sm:$0xff] }
  0xa1   : > { %1589 = vst [vmem:[%s2310_s26 + $0x2a8] sm:$0xff] %v1333_v15  ;;  %v1093_v15 = vmul.f32 %v2280_v5, %v579_v0  ;;  %v1347_v23 = vadd.f32 %v1091_v4, %v834_v3  ;;  %v591_v62 = vld [vmem:[%s2268_s5 + $0x388] sm:$0xff]  ;;  %v846_v0 = vmul.f32 %v2276_v2, %v333_v51  ;;  %v336_v3 = vld [vmem:[%s2260_s20 + $0x390] sm:$0xff] }
  0xa2   : > { %1590 = vst [vmem:[%s2310_s26 + $0x2b0] sm:$0xff] %v1334_v20  ;;  %v1094_v20 = vmul.f32 %v2280_v5, %v580_v7  ;;  %v1348_v28 = vadd.f32 %v1092_v10, %v835_v9  ;;  %v592_v4 = vld [vmem:[%s2268_s5 + $0x390] sm:$0xff]  ;;  %v847_v7 = vmul.f32 %v2276_v2, %v334_v56  ;;  %v337_v9 = vld [vmem:[%s2260_s20 + $0x398] sm:$0xff] }
  0xa3   : > { %1591 = vst [vmem:[%s2310_s26 + $0x2b8] sm:$0xff] %v1335_v25  ;;  %v1095_v25 = vmul.f32 %v2280_v5, %v581_v12  ;;  %v1349_v33 = vadd.f32 %v1093_v15, %v836_v14  ;;  %v593_v10 = vld [vmem:[%s2268_s5 + $0x398] sm:$0xff]  ;;  %v848_v12 = vmul.f32 %v2276_v2, %v335_v61  ;;  %v338_v14 = vld [vmem:[%s2260_s20 + $0x3a0] sm:$0xff] }
  0xa4   : > { %1592 = vst [vmem:[%s2310_s26 + $0x2c0] sm:$0xff] %v1336_v30  ;;  %v1096_v30 = vmul.f32 %v2280_v5, %v582_v17  ;;  %v1350_v38 = vadd.f32 %v1094_v20, %v837_v19  ;;  %v594_v15 = vld [vmem:[%s2268_s5 + $0x3a0] sm:$0xff]  ;;  %v849_v17 = vmul.f32 %v2276_v2, %v336_v3  ;;  %v339_v19 = vld [vmem:[%s2260_s20 + $0x3a8] sm:$0xff] }
  0xa5   : > { %1593 = vst [vmem:[%s2310_s26 + $0x2c8] sm:$0xff] %v1337_v35  ;;  %v1097_v35 = vmul.f32 %v2280_v5, %v583_v22  ;;  %v1351_v43 = vadd.f32 %v1095_v25, %v838_v24  ;;  %v595_v20 = vld [vmem:[%s2268_s5 + $0x3a8] sm:$0xff]  ;;  %v850_v22 = vmul.f32 %v2276_v2, %v337_v9  ;;  %v340_v24 = vld [vmem:[%s2260_s20 + $0x3b0] sm:$0xff] }
  0xa6   : > { %1594 = vst [vmem:[%s2310_s26 + $0x2d0] sm:$0xff] %v1338_v40  ;;  %v1098_v40 = vmul.f32 %v2280_v5, %v584_v27  ;;  %v1352_v48 = vadd.f32 %v1096_v30, %v839_v29  ;;  %v596_v25 = vld [vmem:[%s2268_s5 + $0x3b0] sm:$0xff]  ;;  %v851_v27 = vmul.f32 %v2276_v2, %v338_v14  ;;  %v341_v29 = vld [vmem:[%s2260_s20 + $0x3b8] sm:$0xff] }
  0xa7   : > { %1595 = vst [vmem:[%s2310_s26 + $0x2d8] sm:$0xff] %v1339_v45  ;;  %v1099_v45 = vmul.f32 %v2280_v5, %v585_v32  ;;  %v1353_v53 = vadd.f32 %v1097_v35, %v840_v34  ;;  %v597_v30 = vld [vmem:[%s2268_s5 + $0x3b8] sm:$0xff]  ;;  %v852_v32 = vmul.f32 %v2276_v2, %v339_v19  ;;  %v342_v34 = vld [vmem:[%s2260_s20 + $0x3c0] sm:$0xff] }
  0xa8   : > { %1596 = vst [vmem:[%s2310_s26 + $0x2e0] sm:$0xff] %v1340_v50  ;;  %v1100_v50 = vmul.f32 %v2280_v5, %v586_v37  ;;  %v1354_v58 = vadd.f32 %v1098_v40, %v841_v39  ;;  %v598_v35 = vld [vmem:[%s2268_s5 + $0x3c0] sm:$0xff]  ;;  %v853_v37 = vmul.f32 %v2276_v2, %v340_v24  ;;  %v343_v39 = vld [vmem:[%s2260_s20 + $0x3c8] sm:$0xff] }
  0xa9   : > { %1597 = vst [vmem:[%s2310_s26 + $0x2e8] sm:$0xff] %v1341_v55  ;;  %v1101_v55 = vmul.f32 %v2280_v5, %v587_v42  ;;  %v1355_v63 = vadd.f32 %v1099_v45, %v842_v44  ;;  %v599_v40 = vld [vmem:[%s2268_s5 + $0x3c8] sm:$0xff]  ;;  %v854_v42 = vmul.f32 %v2276_v2, %v341_v29  ;;  %v344_v44 = vld [vmem:[%s2260_s20 + $0x3d0] sm:$0xff] }
  0xaa   : > { %1598 = vst [vmem:[%s2310_s26 + $0x2f0] sm:$0xff] %v1342_v60  ;;  %v1102_v60 = vmul.f32 %v2280_v5, %v588_v47  ;;  %v1356_v6 = vadd.f32 %v1100_v50, %v843_v49  ;;  %v600_v45 = vld [vmem:[%s2268_s5 + $0x3d0] sm:$0xff]  ;;  %v855_v47 = vmul.f32 %v2276_v2, %v342_v34  ;;  %v345_v49 = vld [vmem:[%s2260_s20 + $0x3d8] sm:$0xff] }
  0xab   : > { %1599 = vst [vmem:[%s2310_s26 + $0x2f8] sm:$0xff] %v1343_v1  ;;  %v1103_v1 = vmul.f32 %v2280_v5, %v589_v52  ;;  %v1357_v11 = vadd.f32 %v1101_v55, %v844_v54  ;;  %v601_v50 = vld [vmem:[%s2268_s5 + $0x3d8] sm:$0xff]  ;;  %v856_v52 = vmul.f32 %v2276_v2, %v343_v39  ;;  %v346_v54 = vld [vmem:[%s2260_s20 + $0x3e0] sm:$0xff] }
  0xac   : > { %1600 = vst [vmem:[%s2310_s26 + $0x300] sm:$0xff] %v1344_v8  ;;  %v1104_v8 = vmul.f32 %v2280_v5, %v590_v57  ;;  %v1358_v16 = vadd.f32 %v1102_v60, %v845_v59  ;;  %v602_v55 = vld [vmem:[%s2268_s5 + $0x3e0] sm:$0xff]  ;;  %v857_v57 = vmul.f32 %v2276_v2, %v344_v44  ;;  %v347_v59 = vld [vmem:[%s2260_s20 + $0x3e8] sm:$0xff] }
  0xad   : > { %1601 = vst [vmem:[%s2310_s26 + $0x308] sm:$0xff] %v1345_v13  ;;  %v1105_v13 = vmul.f32 %v2280_v5, %v591_v62  ;;  %v1359_v21 = vadd.f32 %v1103_v1, %v846_v0  ;;  %v603_v60 = vld [vmem:[%s2268_s5 + $0x3e8] sm:$0xff]  ;;  %v858_v62 = vmul.f32 %v2276_v2, %v345_v49  ;;  %v348_v0 = vld [vmem:[%s2260_s20 + $0x3f0] sm:$0xff] }
  0xae   : > { %1602 = vst [vmem:[%s2310_s26 + $0x310] sm:$0xff] %v1346_v18  ;;  %v1106_v18 = vmul.f32 %v2280_v5, %v592_v4  ;;  %v1360_v26 = vadd.f32 %v1104_v8, %v847_v7  ;;  %v604_v1 = vld [vmem:[%s2268_s5 + $0x3f0] sm:$0xff]  ;;  %v859_v4 = vmul.f32 %v2276_v2, %v346_v54  ;;  %v349_v7 = vld [vmem:[%s2260_s20 + $0x3f8] sm:$0xff] }
  0xaf   : > { %1603 = vst [vmem:[%s2310_s26 + $0x318] sm:$0xff] %v1347_v23  ;;  %v1107_v23 = vmul.f32 %v2280_v5, %v593_v10  ;;  %v1361_v31 = vadd.f32 %v1105_v13, %v848_v12  ;;  %v605_v8 = vld [vmem:[%s2268_s5 + $0x3f8] sm:$0xff]  ;;  %v860_v10 = vmul.f32 %v2276_v2, %v347_v59  ;;  %v350_v12 = vld [vmem:[%s2260_s20 + $0x400] sm:$0xff] }
  0xb0   : > { %1604 = vst [vmem:[%s2310_s26 + $0x320] sm:$0xff] %v1348_v28  ;;  %v1108_v28 = vmul.f32 %v2280_v5, %v594_v15  ;;  %v1362_v36 = vadd.f32 %v1106_v18, %v849_v17  ;;  %v606_v13 = vld [vmem:[%s2268_s5 + $0x400] sm:$0xff]  ;;  %v861_v15 = vmul.f32 %v2276_v2, %v348_v0  ;;  %v351_v17 = vld [vmem:[%s2260_s20 + $0x408] sm:$0xff] }
  0xb1   : > { %1605 = vst [vmem:[%s2310_s26 + $0x328] sm:$0xff] %v1349_v33  ;;  %v1109_v33 = vmul.f32 %v2280_v5, %v595_v20  ;;  %v1363_v41 = vadd.f32 %v1107_v23, %v850_v22  ;;  %v607_v18 = vld [vmem:[%s2268_s5 + $0x408] sm:$0xff]  ;;  %v862_v20 = vmul.f32 %v2276_v2, %v349_v7  ;;  %v352_v22 = vld [vmem:[%s2260_s20 + $0x410] sm:$0xff] }
  0xb2   : > { %1606 = vst [vmem:[%s2310_s26 + $0x330] sm:$0xff] %v1350_v38  ;;  %v1110_v38 = vmul.f32 %v2280_v5, %v596_v25  ;;  %v1364_v46 = vadd.f32 %v1108_v28, %v851_v27  ;;  %v608_v23 = vld [vmem:[%s2268_s5 + $0x410] sm:$0xff]  ;;  %v863_v25 = vmul.f32 %v2276_v2, %v350_v12  ;;  %v353_v27 = vld [vmem:[%s2260_s20 + $0x418] sm:$0xff] }
  0xb3   : > { %1607 = vst [vmem:[%s2310_s26 + $0x338] sm:$0xff] %v1351_v43  ;;  %v1111_v43 = vmul.f32 %v2280_v5, %v597_v30  ;;  %v1365_v51 = vadd.f32 %v1109_v33, %v852_v32  ;;  %v609_v28 = vld [vmem:[%s2268_s5 + $0x418] sm:$0xff]  ;;  %v864_v30 = vmul.f32 %v2276_v2, %v351_v17  ;;  %v354_v32 = vld [vmem:[%s2260_s20 + $0x420] sm:$0xff] }
  0xb4   : > { %1608 = vst [vmem:[%s2310_s26 + $0x340] sm:$0xff] %v1352_v48  ;;  %v1112_v48 = vmul.f32 %v2280_v5, %v598_v35  ;;  %v1366_v56 = vadd.f32 %v1110_v38, %v853_v37  ;;  %v610_v33 = vld [vmem:[%s2268_s5 + $0x420] sm:$0xff]  ;;  %v865_v35 = vmul.f32 %v2276_v2, %v352_v22  ;;  %v355_v37 = vld [vmem:[%s2260_s20 + $0x428] sm:$0xff] }
  0xb5   : > { %1609 = vst [vmem:[%s2310_s26 + $0x348] sm:$0xff] %v1353_v53  ;;  %v1113_v53 = vmul.f32 %v2280_v5, %v599_v40  ;;  %v1367_v61 = vadd.f32 %v1111_v43, %v854_v42  ;;  %v611_v38 = vld [vmem:[%s2268_s5 + $0x428] sm:$0xff]  ;;  %v866_v40 = vmul.f32 %v2276_v2, %v353_v27  ;;  %v356_v42 = vld [vmem:[%s2260_s20 + $0x430] sm:$0xff] }
  0xb6   : > { %1610 = vst [vmem:[%s2310_s26 + $0x350] sm:$0xff] %v1354_v58  ;;  %v1114_v58 = vmul.f32 %v2280_v5, %v600_v45  ;;  %v1368_v3 = vadd.f32 %v1112_v48, %v855_v47  ;;  %v612_v43 = vld [vmem:[%s2268_s5 + $0x430] sm:$0xff]  ;;  %v867_v45 = vmul.f32 %v2276_v2, %v354_v32  ;;  %v357_v47 = vld [vmem:[%s2260_s20 + $0x438] sm:$0xff] }
  0xb7   : > { %1611 = vst [vmem:[%s2310_s26 + $0x358] sm:$0xff] %v1355_v63  ;;  %v1115_v63 = vmul.f32 %v2280_v5, %v601_v50  ;;  %v1369_v9 = vadd.f32 %v1113_v53, %v856_v52  ;;  %v613_v48 = vld [vmem:[%s2268_s5 + $0x438] sm:$0xff]  ;;  %v868_v50 = vmul.f32 %v2276_v2, %v355_v37  ;;  %v358_v52 = vld [vmem:[%s2260_s20 + $0x440] sm:$0xff] }
  0xb8   : > { %1612 = vst [vmem:[%s2310_s26 + $0x360] sm:$0xff] %v1356_v6  ;;  %v1116_v6 = vmul.f32 %v2280_v5, %v602_v55  ;;  %v1370_v14 = vadd.f32 %v1114_v58, %v857_v57  ;;  %v614_v53 = vld [vmem:[%s2268_s5 + $0x440] sm:$0xff]  ;;  %v869_v55 = vmul.f32 %v2276_v2, %v356_v42  ;;  %v359_v57 = vld [vmem:[%s2260_s20 + $0x448] sm:$0xff] }
  0xb9   : > { %1613 = vst [vmem:[%s2310_s26 + $0x368] sm:$0xff] %v1357_v11  ;;  %v1117_v11 = vmul.f32 %v2280_v5, %v603_v60  ;;  %v1371_v19 = vadd.f32 %v1115_v63, %v858_v62  ;;  %v615_v58 = vld [vmem:[%s2268_s5 + $0x448] sm:$0xff]  ;;  %v870_v60 = vmul.f32 %v2276_v2, %v357_v47  ;;  %v360_v62 = vld [vmem:[%s2260_s20 + $0x450] sm:$0xff] }
  0xba   : > { %1614 = vst [vmem:[%s2310_s26 + $0x370] sm:$0xff] %v1358_v16  ;;  %v1118_v16 = vmul.f32 %v2280_v5, %v604_v1  ;;  %v1372_v24 = vadd.f32 %v1116_v6, %v859_v4  ;;  %v616_v63 = vld [vmem:[%s2268_s5 + $0x450] sm:$0xff]  ;;  %v871_v1 = vmul.f32 %v2276_v2, %v358_v52  ;;  %v361_v4 = vld [vmem:[%s2260_s20 + $0x458] sm:$0xff] }
  0xbb   : > { %1615 = vst [vmem:[%s2310_s26 + $0x378] sm:$0xff] %v1359_v21  ;;  %v1119_v21 = vmul.f32 %v2280_v5, %v605_v8  ;;  %v1373_v29 = vadd.f32 %v1117_v11, %v860_v10  ;;  %v617_v6 = vld [vmem:[%s2268_s5 + $0x458] sm:$0xff]  ;;  %v872_v8 = vmul.f32 %v2276_v2, %v359_v57  ;;  %v362_v10 = vld [vmem:[%s2260_s20 + $0x460] sm:$0xff] }
  0xbc   : > { %1616 = vst [vmem:[%s2310_s26 + $0x380] sm:$0xff] %v1360_v26  ;;  %v1120_v26 = vmul.f32 %v2280_v5, %v606_v13  ;;  %v1374_v34 = vadd.f32 %v1118_v16, %v861_v15  ;;  %v618_v11 = vld [vmem:[%s2268_s5 + $0x460] sm:$0xff]  ;;  %v873_v13 = vmul.f32 %v2276_v2, %v360_v62  ;;  %v363_v15 = vld [vmem:[%s2260_s20 + $0x468] sm:$0xff] }
  0xbd   : > { %1617 = vst [vmem:[%s2310_s26 + $0x388] sm:$0xff] %v1361_v31  ;;  %v1121_v31 = vmul.f32 %v2280_v5, %v607_v18  ;;  %v1375_v39 = vadd.f32 %v1119_v21, %v862_v20  ;;  %v619_v16 = vld [vmem:[%s2268_s5 + $0x468] sm:$0xff]  ;;  %v874_v18 = vmul.f32 %v2276_v2, %v361_v4  ;;  %v364_v20 = vld [vmem:[%s2260_s20 + $0x470] sm:$0xff] }
  0xbe   : > { %1618 = vst [vmem:[%s2310_s26 + $0x390] sm:$0xff] %v1362_v36  ;;  %v1122_v36 = vmul.f32 %v2280_v5, %v608_v23  ;;  %v1376_v44 = vadd.f32 %v1120_v26, %v863_v25  ;;  %v620_v21 = vld [vmem:[%s2268_s5 + $0x470] sm:$0xff]  ;;  %v875_v23 = vmul.f32 %v2276_v2, %v362_v10  ;;  %v365_v25 = vld [vmem:[%s2260_s20 + $0x478] sm:$0xff] }
  0xbf   : > { %1619 = vst [vmem:[%s2310_s26 + $0x398] sm:$0xff] %v1363_v41  ;;  %v1123_v41 = vmul.f32 %v2280_v5, %v609_v28  ;;  %v1377_v49 = vadd.f32 %v1121_v31, %v864_v30  ;;  %v621_v26 = vld [vmem:[%s2268_s5 + $0x478] sm:$0xff]  ;;  %v876_v28 = vmul.f32 %v2276_v2, %v363_v15  ;;  %v366_v30 = vld [vmem:[%s2260_s20 + $0x480] sm:$0xff] }
  0xc0   : > { %1620 = vst [vmem:[%s2310_s26 + $0x3a0] sm:$0xff] %v1364_v46  ;;  %v1124_v46 = vmul.f32 %v2280_v5, %v610_v33  ;;  %v1378_v54 = vadd.f32 %v1122_v36, %v865_v35  ;;  %v622_v31 = vld [vmem:[%s2268_s5 + $0x480] sm:$0xff]  ;;  %v877_v33 = vmul.f32 %v2276_v2, %v364_v20  ;;  %v367_v35 = vld [vmem:[%s2260_s20 + $0x488] sm:$0xff] }
  0xc1   : > { %1621 = vst [vmem:[%s2310_s26 + $0x3a8] sm:$0xff] %v1365_v51  ;;  %v1125_v51 = vmul.f32 %v2280_v5, %v611_v38  ;;  %v1379_v59 = vadd.f32 %v1123_v41, %v866_v40  ;;  %v623_v36 = vld [vmem:[%s2268_s5 + $0x488] sm:$0xff]  ;;  %v878_v38 = vmul.f32 %v2276_v2, %v365_v25  ;;  %v368_v40 = vld [vmem:[%s2260_s20 + $0x490] sm:$0xff] }
  0xc2   : > { %1622 = vst [vmem:[%s2310_s26 + $0x3b0] sm:$0xff] %v1366_v56  ;;  %v1126_v56 = vmul.f32 %v2280_v5, %v612_v43  ;;  %v1380_v0 = vadd.f32 %v1124_v46, %v867_v45  ;;  %v624_v41 = vld [vmem:[%s2268_s5 + $0x490] sm:$0xff]  ;;  %v879_v43 = vmul.f32 %v2276_v2, %v366_v30  ;;  %v369_v45 = vld [vmem:[%s2260_s20 + $0x498] sm:$0xff] }
  0xc3   : > { %1623 = vst [vmem:[%s2310_s26 + $0x3b8] sm:$0xff] %v1367_v61  ;;  %v1127_v61 = vmul.f32 %v2280_v5, %v613_v48  ;;  %v1381_v7 = vadd.f32 %v1125_v51, %v868_v50  ;;  %v625_v46 = vld [vmem:[%s2268_s5 + $0x498] sm:$0xff]  ;;  %v880_v48 = vmul.f32 %v2276_v2, %v367_v35  ;;  %v370_v50 = vld [vmem:[%s2260_s20 + $0x4a0] sm:$0xff] }
  0xc4   : > { %1624 = vst [vmem:[%s2310_s26 + $0x3c0] sm:$0xff] %v1368_v3  ;;  %v1128_v3 = vmul.f32 %v2280_v5, %v614_v53  ;;  %v1382_v12 = vadd.f32 %v1126_v56, %v869_v55  ;;  %v626_v51 = vld [vmem:[%s2268_s5 + $0x4a0] sm:$0xff]  ;;  %v881_v53 = vmul.f32 %v2276_v2, %v368_v40  ;;  %v371_v55 = vld [vmem:[%s2260_s20 + $0x4a8] sm:$0xff] }
  0xc5   : > { %1625 = vst [vmem:[%s2310_s26 + $0x3c8] sm:$0xff] %v1369_v9  ;;  %v1129_v9 = vmul.f32 %v2280_v5, %v615_v58  ;;  %v1383_v17 = vadd.f32 %v1127_v61, %v870_v60  ;;  %v627_v56 = vld [vmem:[%s2268_s5 + $0x4a8] sm:$0xff]  ;;  %v882_v58 = vmul.f32 %v2276_v2, %v369_v45  ;;  %v372_v60 = vld [vmem:[%s2260_s20 + $0x4b0] sm:$0xff] }
  0xc6   : > { %1626 = vst [vmem:[%s2310_s26 + $0x3d0] sm:$0xff] %v1370_v14  ;;  %v1130_v14 = vmul.f32 %v2280_v5, %v616_v63  ;;  %v1384_v22 = vadd.f32 %v1128_v3, %v871_v1  ;;  %v628_v61 = vld [vmem:[%s2268_s5 + $0x4b0] sm:$0xff]  ;;  %v883_v63 = vmul.f32 %v2276_v2, %v370_v50  ;;  %v373_v1 = vld [vmem:[%s2260_s20 + $0x4b8] sm:$0xff] }
  0xc7   : > { %1627 = vst [vmem:[%s2310_s26 + $0x3d8] sm:$0xff] %v1371_v19  ;;  %v1131_v19 = vmul.f32 %v2280_v5, %v617_v6  ;;  %v1385_v27 = vadd.f32 %v1129_v9, %v872_v8  ;;  %v629_v3 = vld [vmem:[%s2268_s5 + $0x4b8] sm:$0xff]  ;;  %v884_v6 = vmul.f32 %v2276_v2, %v371_v55  ;;  %v374_v8 = vld [vmem:[%s2260_s20 + $0x4c0] sm:$0xff] }
  0xc8   : > { %1628 = vst [vmem:[%s2310_s26 + $0x3e0] sm:$0xff] %v1372_v24  ;;  %v1132_v24 = vmul.f32 %v2280_v5, %v618_v11  ;;  %v1386_v32 = vadd.f32 %v1130_v14, %v873_v13  ;;  %v630_v9 = vld [vmem:[%s2268_s5 + $0x4c0] sm:$0xff]  ;;  %v885_v11 = vmul.f32 %v2276_v2, %v372_v60  ;;  %v375_v13 = vld [vmem:[%s2260_s20 + $0x4c8] sm:$0xff] }
  0xc9   : > { %1629 = vst [vmem:[%s2310_s26 + $0x3e8] sm:$0xff] %v1373_v29  ;;  %v1133_v29 = vmul.f32 %v2280_v5, %v619_v16  ;;  %v1387_v37 = vadd.f32 %v1131_v19, %v874_v18  ;;  %v631_v14 = vld [vmem:[%s2268_s5 + $0x4c8] sm:$0xff]  ;;  %v886_v16 = vmul.f32 %v2276_v2, %v373_v1  ;;  %v376_v18 = vld [vmem:[%s2260_s20 + $0x4d0] sm:$0xff] }
  0xca   : > { %1630 = vst [vmem:[%s2310_s26 + $0x3f0] sm:$0xff] %v1374_v34  ;;  %v1134_v34 = vmul.f32 %v2280_v5, %v620_v21  ;;  %v1388_v42 = vadd.f32 %v1132_v24, %v875_v23  ;;  %v632_v19 = vld [vmem:[%s2268_s5 + $0x4d0] sm:$0xff]  ;;  %v887_v21 = vmul.f32 %v2276_v2, %v374_v8  ;;  %v377_v23 = vld [vmem:[%s2260_s20 + $0x4d8] sm:$0xff] }
  0xcb   : > { %1631 = vst [vmem:[%s2310_s26 + $0x3f8] sm:$0xff] %v1375_v39  ;;  %v1135_v39 = vmul.f32 %v2280_v5, %v621_v26  ;;  %v1389_v47 = vadd.f32 %v1133_v29, %v876_v28  ;;  %v633_v24 = vld [vmem:[%s2268_s5 + $0x4d8] sm:$0xff]  ;;  %v888_v26 = vmul.f32 %v2276_v2, %v375_v13  ;;  %v378_v28 = vld [vmem:[%s2260_s20 + $0x4e0] sm:$0xff] }
  0xcc   : > { %1632 = vst [vmem:[%s2310_s26 + $0x400] sm:$0xff] %v1376_v44  ;;  %v1136_v44 = vmul.f32 %v2280_v5, %v622_v31  ;;  %v1390_v52 = vadd.f32 %v1134_v34, %v877_v33  ;;  %v634_v29 = vld [vmem:[%s2268_s5 + $0x4e0] sm:$0xff]  ;;  %v889_v31 = vmul.f32 %v2276_v2, %v376_v18  ;;  %v379_v33 = vld [vmem:[%s2260_s20 + $0x4e8] sm:$0xff] }
  0xcd   : > { %1633 = vst [vmem:[%s2310_s26 + $0x408] sm:$0xff] %v1377_v49  ;;  %v1137_v49 = vmul.f32 %v2280_v5, %v623_v36  ;;  %v1391_v57 = vadd.f32 %v1135_v39, %v878_v38  ;;  %v635_v34 = vld [vmem:[%s2268_s5 + $0x4e8] sm:$0xff]  ;;  %v890_v36 = vmul.f32 %v2276_v2, %v377_v23  ;;  %v380_v38 = vld [vmem:[%s2260_s20 + $0x4f0] sm:$0xff] }
  0xce   : > { %1634 = vst [vmem:[%s2310_s26 + $0x410] sm:$0xff] %v1378_v54  ;;  %v1138_v54 = vmul.f32 %v2280_v5, %v624_v41  ;;  %v1392_v62 = vadd.f32 %v1136_v44, %v879_v43  ;;  %v636_v39 = vld [vmem:[%s2268_s5 + $0x4f0] sm:$0xff]  ;;  %v891_v41 = vmul.f32 %v2276_v2, %v378_v28  ;;  %v381_v43 = vld [vmem:[%s2260_s20 + $0x4f8] sm:$0xff] }
  0xcf   : > { %1635 = vst [vmem:[%s2310_s26 + $0x418] sm:$0xff] %v1379_v59  ;;  %v1139_v59 = vmul.f32 %v2280_v5, %v625_v46  ;;  %v1393_v4 = vadd.f32 %v1137_v49, %v880_v48  ;;  %v637_v44 = vld [vmem:[%s2268_s5 + $0x4f8] sm:$0xff]  ;;  %v892_v46 = vmul.f32 %v2276_v2, %v379_v33  ;;  %v382_v48 = vld [vmem:[%s2260_s20 + $0x500] sm:$0xff] }
  0xd0   : > { %1636 = vst [vmem:[%s2310_s26 + $0x420] sm:$0xff] %v1380_v0  ;;  %v1140_v0 = vmul.f32 %v2280_v5, %v626_v51  ;;  %v1394_v10 = vadd.f32 %v1138_v54, %v881_v53  ;;  %v638_v49 = vld [vmem:[%s2268_s5 + $0x500] sm:$0xff]  ;;  %v893_v51 = vmul.f32 %v2276_v2, %v380_v38  ;;  %v383_v53 = vld [vmem:[%s2260_s20 + $0x508] sm:$0xff] }
  0xd1   : > { %1637 = vst [vmem:[%s2310_s26 + $0x428] sm:$0xff] %v1381_v7  ;;  %v1141_v7 = vmul.f32 %v2280_v5, %v627_v56  ;;  %v1395_v15 = vadd.f32 %v1139_v59, %v882_v58  ;;  %v639_v54 = vld [vmem:[%s2268_s5 + $0x508] sm:$0xff]  ;;  %v894_v56 = vmul.f32 %v2276_v2, %v381_v43  ;;  %v384_v58 = vld [vmem:[%s2260_s20 + $0x510] sm:$0xff] }
  0xd2   : > { %1638 = vst [vmem:[%s2310_s26 + $0x430] sm:$0xff] %v1382_v12  ;;  %v1142_v12 = vmul.f32 %v2280_v5, %v628_v61  ;;  %v1396_v20 = vadd.f32 %v1140_v0, %v883_v63  ;;  %v640_v59 = vld [vmem:[%s2268_s5 + $0x510] sm:$0xff]  ;;  %v895_v61 = vmul.f32 %v2276_v2, %v382_v48  ;;  %v385_v63 = vld [vmem:[%s2260_s20 + $0x518] sm:$0xff] }
  0xd3   : > { %1639 = vst [vmem:[%s2310_s26 + $0x438] sm:$0xff] %v1383_v17  ;;  %v1143_v17 = vmul.f32 %v2280_v5, %v629_v3  ;;  %v1397_v25 = vadd.f32 %v1141_v7, %v884_v6  ;;  %v641_v0 = vld [vmem:[%s2268_s5 + $0x518] sm:$0xff]  ;;  %v896_v3 = vmul.f32 %v2276_v2, %v383_v53  ;;  %v386_v6 = vld [vmem:[%s2260_s20 + $0x520] sm:$0xff] }
  0xd4   : > { %1640 = vst [vmem:[%s2310_s26 + $0x440] sm:$0xff] %v1384_v22  ;;  %v1144_v22 = vmul.f32 %v2280_v5, %v630_v9  ;;  %v1398_v30 = vadd.f32 %v1142_v12, %v885_v11  ;;  %v642_v7 = vld [vmem:[%s2268_s5 + $0x520] sm:$0xff]  ;;  %v897_v9 = vmul.f32 %v2276_v2, %v384_v58  ;;  %v387_v11 = vld [vmem:[%s2260_s20 + $0x528] sm:$0xff] }
  0xd5   : > { %1641 = vst [vmem:[%s2310_s26 + $0x448] sm:$0xff] %v1385_v27  ;;  %v1145_v27 = vmul.f32 %v2280_v5, %v631_v14  ;;  %v1399_v35 = vadd.f32 %v1143_v17, %v886_v16  ;;  %v643_v12 = vld [vmem:[%s2268_s5 + $0x528] sm:$0xff]  ;;  %v898_v14 = vmul.f32 %v2276_v2, %v385_v63  ;;  %v388_v16 = vld [vmem:[%s2260_s20 + $0x530] sm:$0xff] }
  0xd6   : > { %1642 = vst [vmem:[%s2310_s26 + $0x450] sm:$0xff] %v1386_v32  ;;  %v1146_v32 = vmul.f32 %v2280_v5, %v632_v19  ;;  %v1400_v40 = vadd.f32 %v1144_v22, %v887_v21  ;;  %v644_v17 = vld [vmem:[%s2268_s5 + $0x530] sm:$0xff]  ;;  %v899_v19 = vmul.f32 %v2276_v2, %v386_v6  ;;  %v389_v21 = vld [vmem:[%s2260_s20 + $0x538] sm:$0xff] }
  0xd7   : > { %1643 = vst [vmem:[%s2310_s26 + $0x458] sm:$0xff] %v1387_v37  ;;  %v1147_v37 = vmul.f32 %v2280_v5, %v633_v24  ;;  %v1401_v45 = vadd.f32 %v1145_v27, %v888_v26  ;;  %v645_v22 = vld [vmem:[%s2268_s5 + $0x538] sm:$0xff]  ;;  %v900_v24 = vmul.f32 %v2276_v2, %v387_v11  ;;  %v390_v26 = vld [vmem:[%s2260_s20 + $0x540] sm:$0xff] }
  0xd8   : > { %1644 = vst [vmem:[%s2310_s26 + $0x460] sm:$0xff] %v1388_v42  ;;  %v1148_v42 = vmul.f32 %v2280_v5, %v634_v29  ;;  %v1402_v50 = vadd.f32 %v1146_v32, %v889_v31  ;;  %v646_v27 = vld [vmem:[%s2268_s5 + $0x540] sm:$0xff]  ;;  %v901_v29 = vmul.f32 %v2276_v2, %v388_v16  ;;  %v391_v31 = vld [vmem:[%s2260_s20 + $0x548] sm:$0xff] }
  0xd9   : > { %1645 = vst [vmem:[%s2310_s26 + $0x468] sm:$0xff] %v1389_v47  ;;  %v1149_v47 = vmul.f32 %v2280_v5, %v635_v34  ;;  %v1403_v55 = vadd.f32 %v1147_v37, %v890_v36  ;;  %v647_v32 = vld [vmem:[%s2268_s5 + $0x548] sm:$0xff]  ;;  %v902_v34 = vmul.f32 %v2276_v2, %v389_v21  ;;  %v392_v36 = vld [vmem:[%s2260_s20 + $0x550] sm:$0xff] }
  0xda   : > { %1646 = vst [vmem:[%s2310_s26 + $0x470] sm:$0xff] %v1390_v52  ;;  %v1150_v52 = vmul.f32 %v2280_v5, %v636_v39  ;;  %v1404_v60 = vadd.f32 %v1148_v42, %v891_v41  ;;  %v648_v37 = vld [vmem:[%s2268_s5 + $0x550] sm:$0xff]  ;;  %v903_v39 = vmul.f32 %v2276_v2, %v390_v26  ;;  %v393_v41 = vld [vmem:[%s2260_s20 + $0x558] sm:$0xff] }
  0xdb   : > { %1647 = vst [vmem:[%s2310_s26 + $0x478] sm:$0xff] %v1391_v57  ;;  %v1151_v57 = vmul.f32 %v2280_v5, %v637_v44  ;;  %v1405_v1 = vadd.f32 %v1149_v47, %v892_v46  ;;  %v649_v42 = vld [vmem:[%s2268_s5 + $0x558] sm:$0xff]  ;;  %v904_v44 = vmul.f32 %v2276_v2, %v391_v31  ;;  %v394_v46 = vld [vmem:[%s2260_s20 + $0x560] sm:$0xff] }
  0xdc   : > { %1648 = vst [vmem:[%s2310_s26 + $0x480] sm:$0xff] %v1392_v62  ;;  %v1152_v62 = vmul.f32 %v2280_v5, %v638_v49  ;;  %v1406_v8 = vadd.f32 %v1150_v52, %v893_v51  ;;  %v650_v47 = vld [vmem:[%s2268_s5 + $0x560] sm:$0xff]  ;;  %v905_v49 = vmul.f32 %v2276_v2, %v392_v36  ;;  %v395_v51 = vld [vmem:[%s2260_s20 + $0x568] sm:$0xff] }
  0xdd   : > { %1649 = vst [vmem:[%s2310_s26 + $0x488] sm:$0xff] %v1393_v4  ;;  %v1153_v4 = vmul.f32 %v2280_v5, %v639_v54  ;;  %v1407_v13 = vadd.f32 %v1151_v57, %v894_v56  ;;  %v651_v52 = vld [vmem:[%s2268_s5 + $0x568] sm:$0xff]  ;;  %v906_v54 = vmul.f32 %v2276_v2, %v393_v41  ;;  %v396_v56 = vld [vmem:[%s2260_s20 + $0x570] sm:$0xff] }
  0xde   : > { %1650 = vst [vmem:[%s2310_s26 + $0x490] sm:$0xff] %v1394_v10  ;;  %v1154_v10 = vmul.f32 %v2280_v5, %v640_v59  ;;  %v1408_v18 = vadd.f32 %v1152_v62, %v895_v61  ;;  %v652_v57 = vld [vmem:[%s2268_s5 + $0x570] sm:$0xff]  ;;  %v907_v59 = vmul.f32 %v2276_v2, %v394_v46  ;;  %v397_v61 = vld [vmem:[%s2260_s20 + $0x578] sm:$0xff] }
  0xdf   : > { %1651 = vst [vmem:[%s2310_s26 + $0x498] sm:$0xff] %v1395_v15  ;;  %v1155_v15 = vmul.f32 %v2280_v5, %v641_v0  ;;  %v1409_v23 = vadd.f32 %v1153_v4, %v896_v3  ;;  %v653_v62 = vld [vmem:[%s2268_s5 + $0x578] sm:$0xff]  ;;  %v908_v0 = vmul.f32 %v2276_v2, %v395_v51  ;;  %v398_v3 = vld [vmem:[%s2260_s20 + $0x580] sm:$0xff] }
  0xe0   : > { %1652 = vst [vmem:[%s2310_s26 + $0x4a0] sm:$0xff] %v1396_v20  ;;  %v1156_v20 = vmul.f32 %v2280_v5, %v642_v7  ;;  %v1410_v28 = vadd.f32 %v1154_v10, %v897_v9  ;;  %v654_v4 = vld [vmem:[%s2268_s5 + $0x580] sm:$0xff]  ;;  %v909_v7 = vmul.f32 %v2276_v2, %v396_v56  ;;  %v399_v9 = vld [vmem:[%s2260_s20 + $0x588] sm:$0xff] }
  0xe1   : > { %1653 = vst [vmem:[%s2310_s26 + $0x4a8] sm:$0xff] %v1397_v25  ;;  %v1157_v25 = vmul.f32 %v2280_v5, %v643_v12  ;;  %v1411_v33 = vadd.f32 %v1155_v15, %v898_v14  ;;  %v655_v10 = vld [vmem:[%s2268_s5 + $0x588] sm:$0xff]  ;;  %v910_v12 = vmul.f32 %v2276_v2, %v397_v61  ;;  %v400_v14 = vld [vmem:[%s2260_s20 + $0x590] sm:$0xff] }
  0xe2   : > { %1654 = vst [vmem:[%s2310_s26 + $0x4b0] sm:$0xff] %v1398_v30  ;;  %v1158_v30 = vmul.f32 %v2280_v5, %v644_v17  ;;  %v1412_v38 = vadd.f32 %v1156_v20, %v899_v19  ;;  %v656_v15 = vld [vmem:[%s2268_s5 + $0x590] sm:$0xff]  ;;  %v911_v17 = vmul.f32 %v2276_v2, %v398_v3  ;;  %v401_v19 = vld [vmem:[%s2260_s20 + $0x598] sm:$0xff] }
  0xe3   : > { %1655 = vst [vmem:[%s2310_s26 + $0x4b8] sm:$0xff] %v1399_v35  ;;  %v1159_v35 = vmul.f32 %v2280_v5, %v645_v22  ;;  %v1413_v43 = vadd.f32 %v1157_v25, %v900_v24  ;;  %v657_v20 = vld [vmem:[%s2268_s5 + $0x598] sm:$0xff]  ;;  %v912_v22 = vmul.f32 %v2276_v2, %v399_v9  ;;  %v402_v24 = vld [vmem:[%s2260_s20 + $0x5a0] sm:$0xff] }
  0xe4   : > { %1656 = vst [vmem:[%s2310_s26 + $0x4c0] sm:$0xff] %v1400_v40  ;;  %v1160_v40 = vmul.f32 %v2280_v5, %v646_v27  ;;  %v1414_v48 = vadd.f32 %v1158_v30, %v901_v29  ;;  %v658_v25 = vld [vmem:[%s2268_s5 + $0x5a0] sm:$0xff]  ;;  %v913_v27 = vmul.f32 %v2276_v2, %v400_v14  ;;  %v403_v29 = vld [vmem:[%s2260_s20 + $0x5a8] sm:$0xff] }
  0xe5   : > { %1657 = vst [vmem:[%s2310_s26 + $0x4c8] sm:$0xff] %v1401_v45  ;;  %v1161_v45 = vmul.f32 %v2280_v5, %v647_v32  ;;  %v1415_v53 = vadd.f32 %v1159_v35, %v902_v34  ;;  %v659_v30 = vld [vmem:[%s2268_s5 + $0x5a8] sm:$0xff]  ;;  %v914_v32 = vmul.f32 %v2276_v2, %v401_v19  ;;  %v404_v34 = vld [vmem:[%s2260_s20 + $0x5b0] sm:$0xff] }
  0xe6   : > { %1658 = vst [vmem:[%s2310_s26 + $0x4d0] sm:$0xff] %v1402_v50  ;;  %v1162_v50 = vmul.f32 %v2280_v5, %v648_v37  ;;  %v1416_v58 = vadd.f32 %v1160_v40, %v903_v39  ;;  %v660_v35 = vld [vmem:[%s2268_s5 + $0x5b0] sm:$0xff]  ;;  %v915_v37 = vmul.f32 %v2276_v2, %v402_v24  ;;  %v405_v39 = vld [vmem:[%s2260_s20 + $0x5b8] sm:$0xff] }
  0xe7   : > { %1659 = vst [vmem:[%s2310_s26 + $0x4d8] sm:$0xff] %v1403_v55  ;;  %v1163_v55 = vmul.f32 %v2280_v5, %v649_v42  ;;  %v1417_v63 = vadd.f32 %v1161_v45, %v904_v44  ;;  %v661_v40 = vld [vmem:[%s2268_s5 + $0x5b8] sm:$0xff]  ;;  %v916_v42 = vmul.f32 %v2276_v2, %v403_v29  ;;  %v406_v44 = vld [vmem:[%s2260_s20 + $0x5c0] sm:$0xff] }
  0xe8   : > { %1660 = vst [vmem:[%s2310_s26 + $0x4e0] sm:$0xff] %v1404_v60  ;;  %v1164_v60 = vmul.f32 %v2280_v5, %v650_v47  ;;  %v1418_v6 = vadd.f32 %v1162_v50, %v905_v49  ;;  %v662_v45 = vld [vmem:[%s2268_s5 + $0x5c0] sm:$0xff]  ;;  %v917_v47 = vmul.f32 %v2276_v2, %v404_v34  ;;  %v407_v49 = vld [vmem:[%s2260_s20 + $0x5c8] sm:$0xff] }
  0xe9   : > { %1661 = vst [vmem:[%s2310_s26 + $0x4e8] sm:$0xff] %v1405_v1  ;;  %v1165_v1 = vmul.f32 %v2280_v5, %v651_v52  ;;  %v1419_v11 = vadd.f32 %v1163_v55, %v906_v54  ;;  %v663_v50 = vld [vmem:[%s2268_s5 + $0x5c8] sm:$0xff]  ;;  %v918_v52 = vmul.f32 %v2276_v2, %v405_v39  ;;  %v408_v54 = vld [vmem:[%s2260_s20 + $0x5d0] sm:$0xff] }
  0xea   : > { %1662 = vst [vmem:[%s2310_s26 + $0x4f0] sm:$0xff] %v1406_v8  ;;  %v1166_v8 = vmul.f32 %v2280_v5, %v652_v57  ;;  %v1420_v16 = vadd.f32 %v1164_v60, %v907_v59  ;;  %v664_v55 = vld [vmem:[%s2268_s5 + $0x5d0] sm:$0xff]  ;;  %v919_v57 = vmul.f32 %v2276_v2, %v406_v44  ;;  %v409_v59 = vld [vmem:[%s2260_s20 + $0x5d8] sm:$0xff] }
  0xeb   : > { %1663 = vst [vmem:[%s2310_s26 + $0x4f8] sm:$0xff] %v1407_v13  ;;  %v1167_v13 = vmul.f32 %v2280_v5, %v653_v62  ;;  %v1421_v21 = vadd.f32 %v1165_v1, %v908_v0  ;;  %v665_v60 = vld [vmem:[%s2268_s5 + $0x5d8] sm:$0xff]  ;;  %v920_v62 = vmul.f32 %v2276_v2, %v407_v49  ;;  %v410_v0 = vld [vmem:[%s2260_s20 + $0x5e0] sm:$0xff] }
  0xec   : > { %1664 = vst [vmem:[%s2310_s26 + $0x500] sm:$0xff] %v1408_v18  ;;  %v1168_v18 = vmul.f32 %v2280_v5, %v654_v4  ;;  %v1422_v26 = vadd.f32 %v1166_v8, %v909_v7  ;;  %v666_v1 = vld [vmem:[%s2268_s5 + $0x5e0] sm:$0xff]  ;;  %v921_v4 = vmul.f32 %v2276_v2, %v408_v54  ;;  %v411_v7 = vld [vmem:[%s2260_s20 + $0x5e8] sm:$0xff] }
  0xed   : > { %1665 = vst [vmem:[%s2310_s26 + $0x508] sm:$0xff] %v1409_v23  ;;  %v1169_v23 = vmul.f32 %v2280_v5, %v655_v10  ;;  %v1423_v31 = vadd.f32 %v1167_v13, %v910_v12  ;;  %v667_v8 = vld [vmem:[%s2268_s5 + $0x5e8] sm:$0xff]  ;;  %v922_v10 = vmul.f32 %v2276_v2, %v409_v59  ;;  %v412_v12 = vld [vmem:[%s2260_s20 + $0x5f0] sm:$0xff] }
  0xee   : > { %1666 = vst [vmem:[%s2310_s26 + $0x510] sm:$0xff] %v1410_v28  ;;  %v1170_v28 = vmul.f32 %v2280_v5, %v656_v15  ;;  %v1424_v36 = vadd.f32 %v1168_v18, %v911_v17  ;;  %v668_v13 = vld [vmem:[%s2268_s5 + $0x5f0] sm:$0xff]  ;;  %v923_v15 = vmul.f32 %v2276_v2, %v410_v0  ;;  %v413_v17 = vld [vmem:[%s2260_s20 + $0x5f8] sm:$0xff] }
  0xef   : > { %1667 = vst [vmem:[%s2310_s26 + $0x518] sm:$0xff] %v1411_v33  ;;  %v1171_v33 = vmul.f32 %v2280_v5, %v657_v20  ;;  %v1425_v41 = vadd.f32 %v1169_v23, %v912_v22  ;;  %v669_v18 = vld [vmem:[%s2268_s5 + $0x5f8] sm:$0xff]  ;;  %v924_v20 = vmul.f32 %v2276_v2, %v411_v7  ;;  %v414_v22 = vld [vmem:[%s2260_s20 + $0x600] sm:$0xff] }
  0xf0   : > { %1668 = vst [vmem:[%s2310_s26 + $0x520] sm:$0xff] %v1412_v38  ;;  %v1172_v38 = vmul.f32 %v2280_v5, %v658_v25  ;;  %v1426_v46 = vadd.f32 %v1170_v28, %v913_v27  ;;  %v670_v23 = vld [vmem:[%s2268_s5 + $0x600] sm:$0xff]  ;;  %v925_v25 = vmul.f32 %v2276_v2, %v412_v12  ;;  %v415_v27 = vld [vmem:[%s2260_s20 + $0x608] sm:$0xff] }
  0xf1   : > { %1669 = vst [vmem:[%s2310_s26 + $0x528] sm:$0xff] %v1413_v43  ;;  %v1173_v43 = vmul.f32 %v2280_v5, %v659_v30  ;;  %v1427_v51 = vadd.f32 %v1171_v33, %v914_v32  ;;  %v671_v28 = vld [vmem:[%s2268_s5 + $0x608] sm:$0xff]  ;;  %v926_v30 = vmul.f32 %v2276_v2, %v413_v17  ;;  %v416_v32 = vld [vmem:[%s2260_s20 + $0x610] sm:$0xff] }
  0xf2   : > { %1670 = vst [vmem:[%s2310_s26 + $0x530] sm:$0xff] %v1414_v48  ;;  %v1174_v48 = vmul.f32 %v2280_v5, %v660_v35  ;;  %v1428_v56 = vadd.f32 %v1172_v38, %v915_v37  ;;  %v672_v33 = vld [vmem:[%s2268_s5 + $0x610] sm:$0xff]  ;;  %v927_v35 = vmul.f32 %v2276_v2, %v414_v22  ;;  %v417_v37 = vld [vmem:[%s2260_s20 + $0x618] sm:$0xff] }
  0xf3   : > { %1671 = vst [vmem:[%s2310_s26 + $0x538] sm:$0xff] %v1415_v53  ;;  %v1175_v53 = vmul.f32 %v2280_v5, %v661_v40  ;;  %v1429_v61 = vadd.f32 %v1173_v43, %v916_v42  ;;  %v673_v38 = vld [vmem:[%s2268_s5 + $0x618] sm:$0xff]  ;;  %v928_v40 = vmul.f32 %v2276_v2, %v415_v27  ;;  %v418_v42 = vld [vmem:[%s2260_s20 + $0x620] sm:$0xff] }
  0xf4   : > { %1672 = vst [vmem:[%s2310_s26 + $0x540] sm:$0xff] %v1416_v58  ;;  %v1176_v58 = vmul.f32 %v2280_v5, %v662_v45  ;;  %v1430_v3 = vadd.f32 %v1174_v48, %v917_v47  ;;  %v674_v43 = vld [vmem:[%s2268_s5 + $0x620] sm:$0xff]  ;;  %v929_v45 = vmul.f32 %v2276_v2, %v416_v32  ;;  %v419_v47 = vld [vmem:[%s2260_s20 + $0x628] sm:$0xff] }
  0xf5   : > { %1673 = vst [vmem:[%s2310_s26 + $0x548] sm:$0xff] %v1417_v63  ;;  %v1177_v63 = vmul.f32 %v2280_v5, %v663_v50  ;;  %v1431_v9 = vadd.f32 %v1175_v53, %v918_v52  ;;  %v675_v48 = vld [vmem:[%s2268_s5 + $0x628] sm:$0xff]  ;;  %v930_v50 = vmul.f32 %v2276_v2, %v417_v37  ;;  %v420_v52 = vld [vmem:[%s2260_s20 + $0x630] sm:$0xff] }
  0xf6   : > { %1674 = vst [vmem:[%s2310_s26 + $0x550] sm:$0xff] %v1418_v6  ;;  %v1178_v6 = vmul.f32 %v2280_v5, %v664_v55  ;;  %v1432_v14 = vadd.f32 %v1176_v58, %v919_v57  ;;  %v676_v53 = vld [vmem:[%s2268_s5 + $0x630] sm:$0xff]  ;;  %v931_v55 = vmul.f32 %v2276_v2, %v418_v42  ;;  %v421_v57 = vld [vmem:[%s2260_s20 + $0x638] sm:$0xff] }
  0xf7   : > { %1675 = vst [vmem:[%s2310_s26 + $0x558] sm:$0xff] %v1419_v11  ;;  %v1179_v11 = vmul.f32 %v2280_v5, %v665_v60  ;;  %v1433_v19 = vadd.f32 %v1177_v63, %v920_v62  ;;  %v677_v58 = vld [vmem:[%s2268_s5 + $0x638] sm:$0xff]  ;;  %v932_v60 = vmul.f32 %v2276_v2, %v419_v47  ;;  %v422_v62 = vld [vmem:[%s2260_s20 + $0x640] sm:$0xff] }
  0xf8   : > { %1676 = vst [vmem:[%s2310_s26 + $0x560] sm:$0xff] %v1420_v16  ;;  %v1180_v16 = vmul.f32 %v2280_v5, %v666_v1  ;;  %v1434_v24 = vadd.f32 %v1178_v6, %v921_v4  ;;  %v678_v63 = vld [vmem:[%s2268_s5 + $0x640] sm:$0xff]  ;;  %v933_v1 = vmul.f32 %v2276_v2, %v420_v52  ;;  %v423_v4 = vld [vmem:[%s2260_s20 + $0x648] sm:$0xff] }
  0xf9   : > { %1677 = vst [vmem:[%s2310_s26 + $0x568] sm:$0xff] %v1421_v21  ;;  %v1181_v21 = vmul.f32 %v2280_v5, %v667_v8  ;;  %v1435_v29 = vadd.f32 %v1179_v11, %v922_v10  ;;  %v679_v6 = vld [vmem:[%s2268_s5 + $0x648] sm:$0xff]  ;;  %v934_v8 = vmul.f32 %v2276_v2, %v421_v57  ;;  %v424_v10 = vld [vmem:[%s2260_s20 + $0x650] sm:$0xff] }
  0xfa   : > { %1678 = vst [vmem:[%s2310_s26 + $0x570] sm:$0xff] %v1422_v26  ;;  %v1182_v26 = vmul.f32 %v2280_v5, %v668_v13  ;;  %v1436_v34 = vadd.f32 %v1180_v16, %v923_v15  ;;  %v680_v11 = vld [vmem:[%s2268_s5 + $0x650] sm:$0xff]  ;;  %v935_v13 = vmul.f32 %v2276_v2, %v422_v62  ;;  %v425_v15 = vld [vmem:[%s2260_s20 + $0x658] sm:$0xff] }
  0xfb   : > { %1679 = vst [vmem:[%s2310_s26 + $0x578] sm:$0xff] %v1423_v31  ;;  %v1183_v31 = vmul.f32 %v2280_v5, %v669_v18  ;;  %v1437_v39 = vadd.f32 %v1181_v21, %v924_v20  ;;  %v681_v16 = vld [vmem:[%s2268_s5 + $0x658] sm:$0xff]  ;;  %v936_v18 = vmul.f32 %v2276_v2, %v423_v4  ;;  %v426_v20 = vld [vmem:[%s2260_s20 + $0x660] sm:$0xff] }
  0xfc   : > { %1680 = vst [vmem:[%s2310_s26 + $0x580] sm:$0xff] %v1424_v36  ;;  %v1184_v36 = vmul.f32 %v2280_v5, %v670_v23  ;;  %v1438_v44 = vadd.f32 %v1182_v26, %v925_v25  ;;  %v682_v21 = vld [vmem:[%s2268_s5 + $0x660] sm:$0xff]  ;;  %v937_v23 = vmul.f32 %v2276_v2, %v424_v10  ;;  %v427_v25 = vld [vmem:[%s2260_s20 + $0x668] sm:$0xff] }
  0xfd   : > { %1681 = vst [vmem:[%s2310_s26 + $0x588] sm:$0xff] %v1425_v41  ;;  %v1185_v41 = vmul.f32 %v2280_v5, %v671_v28  ;;  %v1439_v49 = vadd.f32 %v1183_v31, %v926_v30  ;;  %v683_v26 = vld [vmem:[%s2268_s5 + $0x668] sm:$0xff]  ;;  %v938_v28 = vmul.f32 %v2276_v2, %v425_v15  ;;  %v428_v30 = vld [vmem:[%s2260_s20 + $0x670] sm:$0xff] }
  0xfe   : > { %1682 = vst [vmem:[%s2310_s26 + $0x590] sm:$0xff] %v1426_v46  ;;  %v1186_v46 = vmul.f32 %v2280_v5, %v672_v33  ;;  %v1440_v54 = vadd.f32 %v1184_v36, %v927_v35  ;;  %v684_v31 = vld [vmem:[%s2268_s5 + $0x670] sm:$0xff]  ;;  %v939_v33 = vmul.f32 %v2276_v2, %v426_v20  ;;  %v429_v35 = vld [vmem:[%s2260_s20 + $0x678] sm:$0xff] }
  0xff   : > { %1683 = vst [vmem:[%s2310_s26 + $0x598] sm:$0xff] %v1427_v51  ;;  %v1187_v51 = vmul.f32 %v2280_v5, %v673_v38  ;;  %v1441_v59 = vadd.f32 %v1185_v41, %v928_v40  ;;  %v685_v36 = vld [vmem:[%s2268_s5 + $0x678] sm:$0xff]  ;;  %v940_v38 = vmul.f32 %v2276_v2, %v427_v25  ;;  %v430_v40 = vld [vmem:[%s2260_s20 + $0x680] sm:$0xff] }
 0x100   : > { %1684 = vst [vmem:[%s2310_s26 + $0x5a0] sm:$0xff] %v1428_v56  ;;  %v1188_v56 = vmul.f32 %v2280_v5, %v674_v43  ;;  %v1442_v0 = vadd.f32 %v1186_v46, %v929_v45  ;;  %v686_v41 = vld [vmem:[%s2268_s5 + $0x680] sm:$0xff]  ;;  %v941_v43 = vmul.f32 %v2276_v2, %v428_v30  ;;  %v431_v45 = vld [vmem:[%s2260_s20 + $0x688] sm:$0xff] }
 0x101   : > { %1685 = vst [vmem:[%s2310_s26 + $0x5a8] sm:$0xff] %v1429_v61  ;;  %v1189_v61 = vmul.f32 %v2280_v5, %v675_v48  ;;  %v1443_v7 = vadd.f32 %v1187_v51, %v930_v50  ;;  %v687_v46 = vld [vmem:[%s2268_s5 + $0x688] sm:$0xff]  ;;  %v942_v48 = vmul.f32 %v2276_v2, %v429_v35  ;;  %v432_v50 = vld [vmem:[%s2260_s20 + $0x690] sm:$0xff] }
 0x102   : > { %1686 = vst [vmem:[%s2310_s26 + $0x5b0] sm:$0xff] %v1430_v3  ;;  %v1190_v3 = vmul.f32 %v2280_v5, %v676_v53  ;;  %v1444_v12 = vadd.f32 %v1188_v56, %v931_v55  ;;  %v688_v51 = vld [vmem:[%s2268_s5 + $0x690] sm:$0xff]  ;;  %v943_v53 = vmul.f32 %v2276_v2, %v430_v40  ;;  %v433_v55 = vld [vmem:[%s2260_s20 + $0x698] sm:$0xff] }
 0x103   : > { %1687 = vst [vmem:[%s2310_s26 + $0x5b8] sm:$0xff] %v1431_v9  ;;  %v1191_v9 = vmul.f32 %v2280_v5, %v677_v58  ;;  %v1445_v17 = vadd.f32 %v1189_v61, %v932_v60  ;;  %v689_v56 = vld [vmem:[%s2268_s5 + $0x698] sm:$0xff]  ;;  %v944_v58 = vmul.f32 %v2276_v2, %v431_v45  ;;  %v434_v60 = vld [vmem:[%s2260_s20 + $0x6a0] sm:$0xff] }
 0x104   : > { %1688 = vst [vmem:[%s2310_s26 + $0x5c0] sm:$0xff] %v1432_v14  ;;  %v1192_v14 = vmul.f32 %v2280_v5, %v678_v63  ;;  %v1446_v22 = vadd.f32 %v1190_v3, %v933_v1  ;;  %v690_v61 = vld [vmem:[%s2268_s5 + $0x6a0] sm:$0xff]  ;;  %v945_v63 = vmul.f32 %v2276_v2, %v432_v50  ;;  %v435_v1 = vld [vmem:[%s2260_s20 + $0x6a8] sm:$0xff] }
 0x105   : > { %1689 = vst [vmem:[%s2310_s26 + $0x5c8] sm:$0xff] %v1433_v19  ;;  %v1193_v19 = vmul.f32 %v2280_v5, %v679_v6  ;;  %v1447_v27 = vadd.f32 %v1191_v9, %v934_v8  ;;  %v691_v3 = vld [vmem:[%s2268_s5 + $0x6a8] sm:$0xff]  ;;  %v946_v6 = vmul.f32 %v2276_v2, %v433_v55  ;;  %v436_v8 = vld [vmem:[%s2260_s20 + $0x6b0] sm:$0xff] }
 0x106   : > { %1690 = vst [vmem:[%s2310_s26 + $0x5d0] sm:$0xff] %v1434_v24  ;;  %v1194_v24 = vmul.f32 %v2280_v5, %v680_v11  ;;  %v1448_v32 = vadd.f32 %v1192_v14, %v935_v13  ;;  %v692_v9 = vld [vmem:[%s2268_s5 + $0x6b0] sm:$0xff]  ;;  %v947_v11 = vmul.f32 %v2276_v2, %v434_v60  ;;  %v437_v13 = vld [vmem:[%s2260_s20 + $0x6b8] sm:$0xff] }
 0x107   : > { %1691 = vst [vmem:[%s2310_s26 + $0x5d8] sm:$0xff] %v1435_v29  ;;  %v1195_v29 = vmul.f32 %v2280_v5, %v681_v16  ;;  %v1449_v37 = vadd.f32 %v1193_v19, %v936_v18  ;;  %v693_v14 = vld [vmem:[%s2268_s5 + $0x6b8] sm:$0xff]  ;;  %v948_v16 = vmul.f32 %v2276_v2, %v435_v1  ;;  %v438_v18 = vld [vmem:[%s2260_s20 + $0x6c0] sm:$0xff] }
 0x108   : > { %1692 = vst [vmem:[%s2310_s26 + $0x5e0] sm:$0xff] %v1436_v34  ;;  %v1196_v34 = vmul.f32 %v2280_v5, %v682_v21  ;;  %v1450_v42 = vadd.f32 %v1194_v24, %v937_v23  ;;  %v694_v19 = vld [vmem:[%s2268_s5 + $0x6c0] sm:$0xff]  ;;  %v949_v21 = vmul.f32 %v2276_v2, %v436_v8  ;;  %v439_v23 = vld [vmem:[%s2260_s20 + $0x6c8] sm:$0xff] }
 0x109   : > { %1693 = vst [vmem:[%s2310_s26 + $0x5e8] sm:$0xff] %v1437_v39  ;;  %v1197_v39 = vmul.f32 %v2280_v5, %v683_v26  ;;  %v1451_v47 = vadd.f32 %v1195_v29, %v938_v28  ;;  %v695_v24 = vld [vmem:[%s2268_s5 + $0x6c8] sm:$0xff]  ;;  %v950_v26 = vmul.f32 %v2276_v2, %v437_v13  ;;  %v440_v28 = vld [vmem:[%s2260_s20 + $0x6d0] sm:$0xff] }
 0x10a   : > { %1694 = vst [vmem:[%s2310_s26 + $0x5f0] sm:$0xff] %v1438_v44  ;;  %v1198_v44 = vmul.f32 %v2280_v5, %v684_v31  ;;  %v1452_v52 = vadd.f32 %v1196_v34, %v939_v33  ;;  %v696_v29 = vld [vmem:[%s2268_s5 + $0x6d0] sm:$0xff]  ;;  %v951_v31 = vmul.f32 %v2276_v2, %v438_v18  ;;  %v441_v33 = vld [vmem:[%s2260_s20 + $0x6d8] sm:$0xff] }
 0x10b   : > { %1695 = vst [vmem:[%s2310_s26 + $0x5f8] sm:$0xff] %v1439_v49  ;;  %v1199_v49 = vmul.f32 %v2280_v5, %v685_v36  ;;  %v1453_v57 = vadd.f32 %v1197_v39, %v940_v38  ;;  %v697_v34 = vld [vmem:[%s2268_s5 + $0x6d8] sm:$0xff]  ;;  %v952_v36 = vmul.f32 %v2276_v2, %v439_v23  ;;  %v442_v38 = vld [vmem:[%s2260_s20 + $0x6e0] sm:$0xff] }
 0x10c   : > { %1696 = vst [vmem:[%s2310_s26 + $0x600] sm:$0xff] %v1440_v54  ;;  %v1200_v54 = vmul.f32 %v2280_v5, %v686_v41  ;;  %v1454_v62 = vadd.f32 %v1198_v44, %v941_v43  ;;  %v698_v39 = vld [vmem:[%s2268_s5 + $0x6e0] sm:$0xff]  ;;  %v953_v41 = vmul.f32 %v2276_v2, %v440_v28  ;;  %v443_v43 = vld [vmem:[%s2260_s20 + $0x6e8] sm:$0xff] }
 0x10d   : > { %1697 = vst [vmem:[%s2310_s26 + $0x608] sm:$0xff] %v1441_v59  ;;  %v1201_v59 = vmul.f32 %v2280_v5, %v687_v46  ;;  %v1455_v4 = vadd.f32 %v1199_v49, %v942_v48  ;;  %v699_v44 = vld [vmem:[%s2268_s5 + $0x6e8] sm:$0xff]  ;;  %v954_v46 = vmul.f32 %v2276_v2, %v441_v33  ;;  %v444_v48 = vld [vmem:[%s2260_s20 + $0x6f0] sm:$0xff] }
 0x10e   : > { %1698 = vst [vmem:[%s2310_s26 + $0x610] sm:$0xff] %v1442_v0  ;;  %v1202_v0 = vmul.f32 %v2280_v5, %v688_v51  ;;  %v1456_v10 = vadd.f32 %v1200_v54, %v943_v53  ;;  %v700_v49 = vld [vmem:[%s2268_s5 + $0x6f0] sm:$0xff]  ;;  %v955_v51 = vmul.f32 %v2276_v2, %v442_v38  ;;  %v445_v53 = vld [vmem:[%s2260_s20 + $0x6f8] sm:$0xff] }
 0x10f   : > { %1699 = vst [vmem:[%s2310_s26 + $0x618] sm:$0xff] %v1443_v7  ;;  %v1203_v7 = vmul.f32 %v2280_v5, %v689_v56  ;;  %v1457_v15 = vadd.f32 %v1201_v59, %v944_v58  ;;  %v701_v54 = vld [vmem:[%s2268_s5 + $0x6f8] sm:$0xff]  ;;  %v956_v56 = vmul.f32 %v2276_v2, %v443_v43  ;;  %v446_v58 = vld [vmem:[%s2260_s20 + $0x700] sm:$0xff] }
 0x110   : > { %1700 = vst [vmem:[%s2310_s26 + $0x620] sm:$0xff] %v1444_v12  ;;  %v1204_v12 = vmul.f32 %v2280_v5, %v690_v61  ;;  %v1458_v20 = vadd.f32 %v1202_v0, %v945_v63  ;;  %v702_v59 = vld [vmem:[%s2268_s5 + $0x700] sm:$0xff]  ;;  %v957_v61 = vmul.f32 %v2276_v2, %v444_v48  ;;  %v447_v63 = vld [vmem:[%s2260_s20 + $0x708] sm:$0xff] }
 0x111   : > { %1701 = vst [vmem:[%s2310_s26 + $0x628] sm:$0xff] %v1445_v17  ;;  %v1205_v17 = vmul.f32 %v2280_v5, %v691_v3  ;;  %v1459_v25 = vadd.f32 %v1203_v7, %v946_v6  ;;  %v703_v0 = vld [vmem:[%s2268_s5 + $0x708] sm:$0xff]  ;;  %v958_v3 = vmul.f32 %v2276_v2, %v445_v53  ;;  %v448_v6 = vld [vmem:[%s2260_s20 + $0x710] sm:$0xff] }
 0x112   : > { %1702 = vst [vmem:[%s2310_s26 + $0x630] sm:$0xff] %v1446_v22  ;;  %v1206_v22 = vmul.f32 %v2280_v5, %v692_v9  ;;  %v1460_v30 = vadd.f32 %v1204_v12, %v947_v11  ;;  %v704_v7 = vld [vmem:[%s2268_s5 + $0x710] sm:$0xff]  ;;  %v959_v9 = vmul.f32 %v2276_v2, %v446_v58  ;;  %v449_v11 = vld [vmem:[%s2260_s20 + $0x718] sm:$0xff] }
 0x113   : > { %1703 = vst [vmem:[%s2310_s26 + $0x638] sm:$0xff] %v1447_v27  ;;  %v1207_v27 = vmul.f32 %v2280_v5, %v693_v14  ;;  %v1461_v35 = vadd.f32 %v1205_v17, %v948_v16  ;;  %v705_v12 = vld [vmem:[%s2268_s5 + $0x718] sm:$0xff]  ;;  %v960_v14 = vmul.f32 %v2276_v2, %v447_v63  ;;  %v450_v16 = vld [vmem:[%s2260_s20 + $0x720] sm:$0xff] }
 0x114   : > { %1704 = vst [vmem:[%s2310_s26 + $0x640] sm:$0xff] %v1448_v32  ;;  %v1208_v32 = vmul.f32 %v2280_v5, %v694_v19  ;;  %v1462_v40 = vadd.f32 %v1206_v22, %v949_v21  ;;  %v706_v17 = vld [vmem:[%s2268_s5 + $0x720] sm:$0xff]  ;;  %v961_v19 = vmul.f32 %v2276_v2, %v448_v6  ;;  %v451_v21 = vld [vmem:[%s2260_s20 + $0x728] sm:$0xff] }
 0x115   : > { %1705 = vst [vmem:[%s2310_s26 + $0x648] sm:$0xff] %v1449_v37  ;;  %v1209_v37 = vmul.f32 %v2280_v5, %v695_v24  ;;  %v1463_v45 = vadd.f32 %v1207_v27, %v950_v26  ;;  %v707_v22 = vld [vmem:[%s2268_s5 + $0x728] sm:$0xff]  ;;  %v962_v24 = vmul.f32 %v2276_v2, %v449_v11  ;;  %v452_v26 = vld [vmem:[%s2260_s20 + $0x730] sm:$0xff] }
 0x116   : > { %1706 = vst [vmem:[%s2310_s26 + $0x650] sm:$0xff] %v1450_v42  ;;  %v1210_v42 = vmul.f32 %v2280_v5, %v696_v29  ;;  %v1464_v50 = vadd.f32 %v1208_v32, %v951_v31  ;;  %v708_v27 = vld [vmem:[%s2268_s5 + $0x730] sm:$0xff]  ;;  %v963_v29 = vmul.f32 %v2276_v2, %v450_v16  ;;  %v453_v31 = vld [vmem:[%s2260_s20 + $0x738] sm:$0xff] }
 0x117   : > { %1707 = vst [vmem:[%s2310_s26 + $0x658] sm:$0xff] %v1451_v47  ;;  %v1211_v47 = vmul.f32 %v2280_v5, %v697_v34  ;;  %v1465_v55 = vadd.f32 %v1209_v37, %v952_v36  ;;  %v709_v32 = vld [vmem:[%s2268_s5 + $0x738] sm:$0xff]  ;;  %v964_v34 = vmul.f32 %v2276_v2, %v451_v21  ;;  %v454_v36 = vld [vmem:[%s2260_s20 + $0x740] sm:$0xff] }
 0x118   : > { %1708 = vst [vmem:[%s2310_s26 + $0x660] sm:$0xff] %v1452_v52  ;;  %v1212_v52 = vmul.f32 %v2280_v5, %v698_v39  ;;  %v1466_v60 = vadd.f32 %v1210_v42, %v953_v41  ;;  %v710_v37 = vld [vmem:[%s2268_s5 + $0x740] sm:$0xff]  ;;  %v965_v39 = vmul.f32 %v2276_v2, %v452_v26  ;;  %v455_v41 = vld [vmem:[%s2260_s20 + $0x748] sm:$0xff] }
 0x119   : > { %1709 = vst [vmem:[%s2310_s26 + $0x668] sm:$0xff] %v1453_v57  ;;  %v1213_v57 = vmul.f32 %v2280_v5, %v699_v44  ;;  %v1467_v1 = vadd.f32 %v1211_v47, %v954_v46  ;;  %v711_v42 = vld [vmem:[%s2268_s5 + $0x748] sm:$0xff]  ;;  %v966_v44 = vmul.f32 %v2276_v2, %v453_v31  ;;  %v456_v46 = vld [vmem:[%s2260_s20 + $0x750] sm:$0xff] }
 0x11a   : > { %1710 = vst [vmem:[%s2310_s26 + $0x670] sm:$0xff] %v1454_v62  ;;  %v1214_v62 = vmul.f32 %v2280_v5, %v700_v49  ;;  %v1468_v8 = vadd.f32 %v1212_v52, %v955_v51  ;;  %v712_v47 = vld [vmem:[%s2268_s5 + $0x750] sm:$0xff]  ;;  %v967_v49 = vmul.f32 %v2276_v2, %v454_v36  ;;  %v457_v51 = vld [vmem:[%s2260_s20 + $0x758] sm:$0xff] }
 0x11b   : > { %1711 = vst [vmem:[%s2310_s26 + $0x678] sm:$0xff] %v1455_v4  ;;  %v1215_v4 = vmul.f32 %v2280_v5, %v701_v54  ;;  %v1469_v13 = vadd.f32 %v1213_v57, %v956_v56  ;;  %v713_v52 = vld [vmem:[%s2268_s5 + $0x758] sm:$0xff]  ;;  %v968_v54 = vmul.f32 %v2276_v2, %v455_v41  ;;  %v458_v56 = vld [vmem:[%s2260_s20 + $0x760] sm:$0xff] }
 0x11c   : > { %1712 = vst [vmem:[%s2310_s26 + $0x680] sm:$0xff] %v1456_v10  ;;  %v1216_v10 = vmul.f32 %v2280_v5, %v702_v59  ;;  %v1470_v18 = vadd.f32 %v1214_v62, %v957_v61  ;;  %v714_v57 = vld [vmem:[%s2268_s5 + $0x760] sm:$0xff]  ;;  %v969_v59 = vmul.f32 %v2276_v2, %v456_v46  ;;  %v459_v61 = vld [vmem:[%s2260_s20 + $0x768] sm:$0xff] }
 0x11d   : > { %1713 = vst [vmem:[%s2310_s26 + $0x688] sm:$0xff] %v1457_v15  ;;  %v1217_v15 = vmul.f32 %v2280_v5, %v703_v0  ;;  %v1471_v23 = vadd.f32 %v1215_v4, %v958_v3  ;;  %v715_v62 = vld [vmem:[%s2268_s5 + $0x768] sm:$0xff]  ;;  %v970_v0 = vmul.f32 %v2276_v2, %v457_v51  ;;  %v460_v3 = vld [vmem:[%s2260_s20 + $0x770] sm:$0xff] }
 0x11e   : > { %1714 = vst [vmem:[%s2310_s26 + $0x690] sm:$0xff] %v1458_v20  ;;  %v1218_v20 = vmul.f32 %v2280_v5, %v704_v7  ;;  %v1472_v28 = vadd.f32 %v1216_v10, %v959_v9  ;;  %v716_v4 = vld [vmem:[%s2268_s5 + $0x770] sm:$0xff]  ;;  %v971_v7 = vmul.f32 %v2276_v2, %v458_v56  ;;  %v461_v9 = vld [vmem:[%s2260_s20 + $0x778] sm:$0xff] }
 0x11f   : > { %1715 = vst [vmem:[%s2310_s26 + $0x698] sm:$0xff] %v1459_v25  ;;  %v1219_v25 = vmul.f32 %v2280_v5, %v705_v12  ;;  %v1473_v33 = vadd.f32 %v1217_v15, %v960_v14  ;;  %v717_v10 = vld [vmem:[%s2268_s5 + $0x778] sm:$0xff]  ;;  %v972_v12 = vmul.f32 %v2276_v2, %v459_v61  ;;  %v462_v14 = vld [vmem:[%s2260_s20 + $0x780] sm:$0xff] }
 0x120   : > { %1716 = vst [vmem:[%s2310_s26 + $0x6a0] sm:$0xff] %v1460_v30  ;;  %v1220_v30 = vmul.f32 %v2280_v5, %v706_v17  ;;  %v1474_v38 = vadd.f32 %v1218_v20, %v961_v19  ;;  %v718_v15 = vld [vmem:[%s2268_s5 + $0x780] sm:$0xff]  ;;  %v973_v17 = vmul.f32 %v2276_v2, %v460_v3  ;;  %v463_v19 = vld [vmem:[%s2260_s20 + $0x788] sm:$0xff] }
 0x121   : > { %1717 = vst [vmem:[%s2310_s26 + $0x6a8] sm:$0xff] %v1461_v35  ;;  %v1221_v35 = vmul.f32 %v2280_v5, %v707_v22  ;;  %v1475_v43 = vadd.f32 %v1219_v25, %v962_v24  ;;  %v719_v20 = vld [vmem:[%s2268_s5 + $0x788] sm:$0xff]  ;;  %v974_v22 = vmul.f32 %v2276_v2, %v461_v9  ;;  %v464_v24 = vld [vmem:[%s2260_s20 + $0x790] sm:$0xff] }
 0x122   : > { %1718 = vst [vmem:[%s2310_s26 + $0x6b0] sm:$0xff] %v1462_v40  ;;  %v1222_v40 = vmul.f32 %v2280_v5, %v708_v27  ;;  %v1476_v48 = vadd.f32 %v1220_v30, %v963_v29  ;;  %v720_v25 = vld [vmem:[%s2268_s5 + $0x790] sm:$0xff]  ;;  %v975_v27 = vmul.f32 %v2276_v2, %v462_v14  ;;  %v465_v29 = vld [vmem:[%s2260_s20 + $0x798] sm:$0xff] }
 0x123   : > { %1719 = vst [vmem:[%s2310_s26 + $0x6b8] sm:$0xff] %v1463_v45  ;;  %v1223_v45 = vmul.f32 %v2280_v5, %v709_v32  ;;  %v1477_v53 = vadd.f32 %v1221_v35, %v964_v34  ;;  %v721_v30 = vld [vmem:[%s2268_s5 + $0x798] sm:$0xff]  ;;  %v976_v32 = vmul.f32 %v2276_v2, %v463_v19  ;;  %v466_v34 = vld [vmem:[%s2260_s20 + $0x7a0] sm:$0xff] }
 0x124   : > { %1720 = vst [vmem:[%s2310_s26 + $0x6c0] sm:$0xff] %v1464_v50  ;;  %v1224_v50 = vmul.f32 %v2280_v5, %v710_v37  ;;  %v1478_v58 = vadd.f32 %v1222_v40, %v965_v39  ;;  %v722_v35 = vld [vmem:[%s2268_s5 + $0x7a0] sm:$0xff]  ;;  %v977_v37 = vmul.f32 %v2276_v2, %v464_v24  ;;  %v467_v39 = vld [vmem:[%s2260_s20 + $0x7a8] sm:$0xff] }
 0x125   : > { %1721 = vst [vmem:[%s2310_s26 + $0x6c8] sm:$0xff] %v1465_v55  ;;  %v1225_v55 = vmul.f32 %v2280_v5, %v711_v42  ;;  %v1479_v63 = vadd.f32 %v1223_v45, %v966_v44  ;;  %v723_v40 = vld [vmem:[%s2268_s5 + $0x7a8] sm:$0xff]  ;;  %v978_v42 = vmul.f32 %v2276_v2, %v465_v29  ;;  %v468_v44 = vld [vmem:[%s2260_s20 + $0x7b0] sm:$0xff] }
 0x126   : > { %1722 = vst [vmem:[%s2310_s26 + $0x6d0] sm:$0xff] %v1466_v60  ;;  %v1226_v60 = vmul.f32 %v2280_v5, %v712_v47  ;;  %v1480_v6 = vadd.f32 %v1224_v50, %v967_v49  ;;  %v724_v45 = vld [vmem:[%s2268_s5 + $0x7b0] sm:$0xff]  ;;  %v979_v47 = vmul.f32 %v2276_v2, %v466_v34  ;;  %v469_v49 = vld [vmem:[%s2260_s20 + $0x7b8] sm:$0xff] }
 0x127   : > { %1723 = vst [vmem:[%s2310_s26 + $0x6d8] sm:$0xff] %v1467_v1  ;;  %v1227_v1 = vmul.f32 %v2280_v5, %v713_v52  ;;  %v1481_v11 = vadd.f32 %v1225_v55, %v968_v54  ;;  %v725_v50 = vld [vmem:[%s2268_s5 + $0x7b8] sm:$0xff]  ;;  %v980_v52 = vmul.f32 %v2276_v2, %v467_v39  ;;  %v470_v54 = vld [vmem:[%s2260_s20 + $0x7c0] sm:$0xff] }
 0x128   : > { %1724 = vst [vmem:[%s2310_s26 + $0x6e0] sm:$0xff] %v1468_v8  ;;  %v1228_v8 = vmul.f32 %v2280_v5, %v714_v57  ;;  %v1482_v16 = vadd.f32 %v1226_v60, %v969_v59  ;;  %v726_v55 = vld [vmem:[%s2268_s5 + $0x7c0] sm:$0xff]  ;;  %v981_v57 = vmul.f32 %v2276_v2, %v468_v44  ;;  %v471_v59 = vld [vmem:[%s2260_s20 + $0x7c8] sm:$0xff] }
 0x129   : > { %1725 = vst [vmem:[%s2310_s26 + $0x6e8] sm:$0xff] %v1469_v13  ;;  %v1229_v13 = vmul.f32 %v2280_v5, %v715_v62  ;;  %v1483_v21 = vadd.f32 %v1227_v1, %v970_v0  ;;  %v727_v60 = vld [vmem:[%s2268_s5 + $0x7c8] sm:$0xff]  ;;  %v982_v62 = vmul.f32 %v2276_v2, %v469_v49  ;;  %v472_v0 = vld [vmem:[%s2260_s20 + $0x7d0] sm:$0xff] }
 0x12a   : > { %1726 = vst [vmem:[%s2310_s26 + $0x6f0] sm:$0xff] %v1470_v18  ;;  %v1230_v18 = vmul.f32 %v2280_v5, %v716_v4  ;;  %v1484_v26 = vadd.f32 %v1228_v8, %v971_v7  ;;  %v728_v1 = vld [vmem:[%s2268_s5 + $0x7d0] sm:$0xff]  ;;  %v983_v4 = vmul.f32 %v2276_v2, %v470_v54  ;;  %v473_v7 = vld [vmem:[%s2260_s20 + $0x7d8] sm:$0xff] }
 0x12b   : > { %1727 = vst [vmem:[%s2310_s26 + $0x6f8] sm:$0xff] %v1471_v23  ;;  %v1231_v23 = vmul.f32 %v2280_v5, %v717_v10  ;;  %v1485_v31 = vadd.f32 %v1229_v13, %v972_v12  ;;  %v729_v8 = vld [vmem:[%s2268_s5 + $0x7d8] sm:$0xff]  ;;  %v984_v10 = vmul.f32 %v2276_v2, %v471_v59  ;;  %v474_v12 = vld [vmem:[%s2260_s20 + $0x7e0] sm:$0xff] }
 0x12c   : > { %1728 = vst [vmem:[%s2310_s26 + $0x700] sm:$0xff] %v1472_v28  ;;  %v1232_v28 = vmul.f32 %v2280_v5, %v718_v15  ;;  %v1486_v36 = vadd.f32 %v1230_v18, %v973_v17  ;;  %v730_v13 = vld [vmem:[%s2268_s5 + $0x7e0] sm:$0xff]  ;;  %v985_v15 = vmul.f32 %v2276_v2, %v472_v0  ;;  %v475_v17 = vld [vmem:[%s2260_s20 + $0x7e8] sm:$0xff] }
 0x12d   : > { %1729 = vst [vmem:[%s2310_s26 + $0x708] sm:$0xff] %v1473_v33  ;;  %v1233_v33 = vmul.f32 %v2280_v5, %v719_v20  ;;  %v1487_v41 = vadd.f32 %v1231_v23, %v974_v22  ;;  %v731_v18 = vld [vmem:[%s2268_s5 + $0x7e8] sm:$0xff]  ;;  %v986_v20 = vmul.f32 %v2276_v2, %v473_v7  ;;  %v476_v22 = vld [vmem:[%s2260_s20 + $0x7f0] sm:$0xff] }
 0x12e   : > { %1730 = vst [vmem:[%s2310_s26 + $0x710] sm:$0xff] %v1474_v38  ;;  %v1234_v38 = vmul.f32 %v2280_v5, %v720_v25  ;;  %v1488_v46 = vadd.f32 %v1232_v28, %v975_v27  ;;  %v732_v23 = vld [vmem:[%s2268_s5 + $0x7f0] sm:$0xff]  ;;  %v987_v25 = vmul.f32 %v2276_v2, %v474_v12  ;;  %v477_v27 = vld [vmem:[%s2260_s20 + $0x7f8] sm:$0xff] }
 0x12f   : > { %1731 = vst [vmem:[%s2310_s26 + $0x718] sm:$0xff] %v1475_v43  ;;  %v1235_v43 = vmul.f32 %v2280_v5, %v721_v30  ;;  %v1489_v51 = vadd.f32 %v1233_v33, %v976_v32  ;;  %v733_v28 = vld [vmem:[%s2268_s5 + $0x7f8] sm:$0xff]  ;;  %v988_v30 = vmul.f32 %v2276_v2, %v475_v17  ;;  %v989_v33 = vmul.f32 %v2276_v2, %v476_v22 }
 0x130   : > { %1732 = vst [vmem:[%s2310_s26 + $0x720] sm:$0xff] %v1476_v48  ;;  %v1236_v48 = vmul.f32 %v2280_v5, %v722_v35  ;;  %v1490_v56 = vadd.f32 %v1234_v38, %v977_v37  ;;  %v1246_v34 = vmul.f32 %v2280_v5, %v732_v23  ;;  %v1247_v37 = vmul.f32 %v2280_v5, %v733_v28 }
 0x131   : > { %1733 = vst [vmem:[%s2310_s26 + $0x728] sm:$0xff] %v1477_v53  ;;  %v1237_v53 = vmul.f32 %v2280_v5, %v723_v40  ;;  %v1491_v61 = vadd.f32 %v1235_v43, %v978_v42 }
 0x132   : > { %1734 = vst [vmem:[%s2310_s26 + $0x730] sm:$0xff] %v1478_v58  ;;  %v1238_v58 = vmul.f32 %v2280_v5, %v724_v45  ;;  %v1492_v3 = vadd.f32 %v1236_v48, %v979_v47  ;;  %v1502_v40 = vadd.f32 %v1246_v34, %v989_v33 }
 0x133   : > { %1735 = vst [vmem:[%s2310_s26 + $0x738] sm:$0xff] %v1479_v63  ;;  %v1239_v63 = vmul.f32 %v2280_v5, %v725_v50  ;;  %v1493_v9 = vadd.f32 %v1237_v53, %v980_v52 }
 0x134   : > { %1736 = vst [vmem:[%s2310_s26 + $0x740] sm:$0xff] %v1480_v6  ;;  %v1240_v6 = vmul.f32 %v2280_v5, %v726_v55  ;;  %v1494_v14 = vadd.f32 %v1238_v58, %v981_v57 }
 0x135   : > { %1737 = vst [vmem:[%s2310_s26 + $0x748] sm:$0xff] %v1481_v11  ;;  %v1241_v11 = vmul.f32 %v2280_v5, %v727_v60  ;;  %v1495_v19 = vadd.f32 %v1239_v63, %v982_v62 }
 0x136   : > { %1738 = vst [vmem:[%s2310_s26 + $0x750] sm:$0xff] %v1482_v16  ;;  %v1242_v16 = vmul.f32 %v2280_v5, %v728_v1  ;;  %v1496_v24 = vadd.f32 %v1240_v6, %v983_v4 }
 0x137   : > { %1739 = vst [vmem:[%s2310_s26 + $0x758] sm:$0xff] %v1483_v21  ;;  %v1243_v21 = vmul.f32 %v2280_v5, %v729_v8  ;;  %v1497_v29 = vadd.f32 %v1241_v11, %v984_v10 }
 0x138   : > { %1740 = vst [vmem:[%s2310_s26 + $0x760] sm:$0xff] %v1484_v26  ;;  %v1244_v26 = vmul.f32 %v2280_v5, %v730_v13  ;;  %v1498_v32 = vadd.f32 %v1242_v16, %v985_v15 }
 0x139   : > { %1741 = vst [vmem:[%s2310_s26 + $0x768] sm:$0xff] %v1485_v31  ;;  %v1245_v31 = vmul.f32 %v2280_v5, %v731_v18  ;;  %v1499_v35 = vadd.f32 %v1243_v21, %v986_v20 }
 0x13a   : > { %1742 = vst [vmem:[%s2310_s26 + $0x770] sm:$0xff] %v1486_v36  ;;  %v990_v36 = vmul.f32 %v2276_v2, %v477_v27  ;;  %v1500_v38 = vadd.f32 %v1244_v26, %v987_v25 }
 0x13b   : > { %1743 = vst [vmem:[%s2310_s26 + $0x778] sm:$0xff] %v1487_v41  ;;  %v1501_v39 = vadd.f32 %v1245_v31, %v988_v30 }
 0x13c   : > { %1744 = vst [vmem:[%s2310_s26 + $0x780] sm:$0xff] %v1488_v46  ;;  %v1503_v41 = vadd.f32 %v1247_v37, %v990_v36 }
 0x13d   : > { %1745 = vst [vmem:[%s2310_s26 + $0x788] sm:$0xff] %v1489_v51 }
 0x13e   : > { %1746 = vst [vmem:[%s2310_s26 + $0x790] sm:$0xff] %v1490_v56 }
 0x13f   : > { %1747 = vst [vmem:[%s2310_s26 + $0x798] sm:$0xff] %v1491_v61 }
 0x140   : > { %1748 = vst [vmem:[%s2310_s26 + $0x7a0] sm:$0xff] %v1492_v3 }
 0x141   : > { %1749 = vst [vmem:[%s2310_s26 + $0x7a8] sm:$0xff] %v1493_v9 }
 0x142   : > { %1750 = vst [vmem:[%s2310_s26 + $0x7b0] sm:$0xff] %v1494_v14 }
 0x143   : > { %1751 = vst [vmem:[%s2310_s26 + $0x7b8] sm:$0xff] %v1495_v19 }
 0x144   : > { %1752 = vst [vmem:[%s2310_s26 + $0x7c0] sm:$0xff] %v1496_v24 }
 0x145   : > { %1753 = vst [vmem:[%s2310_s26 + $0x7c8] sm:$0xff] %v1497_v29 }
 0x146   : > { %1754 = vst [vmem:[%s2310_s26 + $0x7d0] sm:$0xff] %v1498_v32 }
 0x147   : > { %1755 = vst [vmem:[%s2310_s26 + $0x7d8] sm:$0xff] %v1499_v35 }
 0x148   : > { %1756 = vst [vmem:[%s2310_s26 + $0x7e0] sm:$0xff] %v1500_v38 }
 0x149   : > { %1757 = vst [vmem:[%s2310_s26 + $0x7e8] sm:$0xff] %v1501_v39 }
 0x14a   : > { %1758 = vst [vmem:[%s2310_s26 + $0x7f0] sm:$0xff] %v1502_v40 }
 0x14b   : > { %1759 = vst [vmem:[%s2310_s26 + $0x7f8] sm:$0xff] %v1503_v41 }
 0x14c   : > { %2056 = shalt.err (!%p2053_p0)
}
 0x14d   : > { %s2106_s29 = smov 1024   ;;  %s2107_s11 = smov 64  }
 0x14e   : > { %1905 = dma.vmem_to_hbm [thread:$0]  (%p2181_p11), %s1775_s25, 32768, %s1777_s8, %s1761_s10, %s2106_s29, %s2106_s29, %s2107_s11  }
 0x14f PF: > { %s1791_s5 = sand.u32 1, %s2089_s16   ;;  %p3605_p1 = scmp.ge.s32.totalorder %s2101_s19, 2 }
 0x150   : > { %s1792_s6 = scalar_lea.sflag [#allocation6], %s1791_s5 }
 0x151   : > { %p1915_p4 = pnand %p3605_p1, %p2185_p12 }
 0x153   : > { %p1916_p7 = pneg %p1915_p4 }
 0x155   : > { %2084 = dma.done.wait (%p1916_p7), %s1792_s6, 32768  }
 0x156   : > { %2086 = vsyncadd (%p1916_p7), %s1792_s6, 4294934528  ;;  %p27_p5 = scmp.ge.s32.totalorder %s2156_s21, 4   ;;  %s3606_s16 = smov %s2093_s17 }
 0x157   : > { %s3607_s17 = smov %s2097_s18  ;;  %s3608_s18 = smov %s2168_s24 }
 0x158   : > { %s3609_s19 = smov %s2156_s21  ;;  %29 = sbr.rel (!%p27_p5) target bundleno = 13 (0xd), region = 86 }
 0x15d   :  { %1798 = vsyncpa [#allocation5], 1 }
 0x15e   :  { %1800 = vsyncpa [#allocation5 + $0x1], 1 }
 0x15f   :  { %1801 = vsyncpa [#allocation8], 1 }
 0x160   :  { %1803 = vsyncpa [#allocation8 + $0x1], 1 }
 0x161   :  { %1804 = vsyncpa [#allocation6], 1 }
 0x162   :  { %1806 = vsyncpa [#allocation6 + $0x1], 1 }

</bundles_post_ra>
